<compile_context>
chip_gen: v5e
topology: v5e:2x2
jax: 0.10.0
libtpu: 0.0.40
codegen_flags: <defaults>
</compile_context>

<pallas_src>
import functools
import math

import jax
import jax.numpy as jnp
from jax.experimental import pallas as pl
from jax.experimental.pallas import tpu as pltpu

LN_EPS = 1e-5
NEG_INF = -1e30
MASK_BIG = 1e9


def _layernorm(x, gamma, beta):
    mu = jnp.mean(x, axis=-1, keepdims=True)
    var = jnp.mean(jnp.square(x - mu), axis=-1, keepdims=True)
    return (x - mu) * jax.lax.rsqrt(var + LN_EPS) * gamma + beta


# ---------------------------------------------------------------------------
# Fused kernel: one grid step = one tile of Bt whole sequences (Tt = Bt*S tokens).
#   x_ref:    [Tt, D]   f32   batch-major token slab (rows b*S + s)
#   bias_ref: [S, S]    f32   additive attention bias (0 keep / -1e9 masked), resident
#   wqkv_ref: [D, 3D]   bf16  (Wq^T*scale | Wk^T | Wv^T), bqkv [1, 3D] f32 (bq*scale|bk|bv)
#   wo_ref:   [D, D]    bf16, bo [1, D] f32
#   sw_ref:   [D, E]    bf16, sb [1, E] f32
#   w1_ref:   [E, D, F] bf16, b1 [E, F] f32
#   w2_ref:   [E, F, D] bf16, b2 [E, D] f32
# outputs:   out [Tt, D] f32, rp [Tt, E] f32 (router softmax probabilities)
# ---------------------------------------------------------------------------
def switch_layer_kernel(x_ref, bias_ref, ln1_g_ref, ln1_b_ref,
                        wqkv_ref, bqkv_ref, wo_ref, bo_ref,
                        ln2_g_ref, ln2_b_ref, sw_ref, sb_ref,
                        w1_ref, b1_ref, w2_ref, b2_ref,
                        out_ref, rp_ref, *, n_heads, d_k, batches_per_tile, seq_len):
    f32 = jnp.float32
    bf16 = jnp.bfloat16
    H, Dk, Bt, S = n_heads, d_k, batches_per_tile, seq_len
    D = H * Dk
    Tt = Bt * S
    E = sw_ref.shape[1]

    x = x_ref[...]                                              # [Tt, D] f32

    # ---------------- pre-LN multi-head self-attention + residual ----------
    z = _layernorm(x, ln1_g_ref[...], ln1_b_ref[...])
    zb = z.astype(bf16)

    # fused lane-dense QKV projection: one [Tt,D] @ [D,3D] matmul
    qkv = jnp.dot(zb, wqkv_ref[...], preferred_element_type=f32) + bqkv_ref[...]
    q = qkv[:, 0:D]                 # 1/sqrt(Dk) already folded into Wq/bq
    k = qkv[:, D:2 * D]
    v = qkv[:, 2 * D:3 * D]

    bias = bias_ref[...]                                        # [S, S]

    # attention per sequence inside the tile; all heads in ONE batched
    # dot_general per einsum (no per-head Dk=8 slices / column stores).
    o_parts = []
    for b in range(Bt):                                         # static loop
        rows = slice(b * S, (b + 1) * S)
        qb = q[rows, :].reshape(S, H, Dk).astype(bf16)
        kb = k[rows, :].reshape(S, H, Dk).astype(bf16)
        vb = v[rows, :].reshape(S, H, Dk).astype(bf16)
        s = jnp.einsum('qhd,khd->hqk', qb, kb,
                       preferred_element_type=f32)              # [H, S, S]
        s = s + bias[None, :, :]
        m = jnp.max(s, axis=-1, keepdims=True)
        p = jnp.exp(s - m)                                      # unnormalized
        l = jnp.sum(p, axis=-1, keepdims=True)                  # [H, S, 1]
        o = jnp.einsum('hqk,khd->hqd', p.astype(bf16), vb,
                       preferred_element_type=f32)              # [H, S, Dk]
        o = o * pl.reciprocal(l, approx=True)                   # normalize post-PV
        o_parts.append(jnp.transpose(o, (1, 0, 2)).reshape(S, D))
    o_all = o_parts[0] if Bt == 1 else jnp.concatenate(o_parts, axis=0)   # [Tt, D]

    # fused output projection: one [Tt,D] @ [D,D] matmul
    attn_out = jnp.dot(o_all.astype(bf16), wo_ref[...],
                       preferred_element_type=f32) + bo_ref[...]
    h1 = x + attn_out                                           # [Tt, D]

    # ---------------- pre-LN Switch-MoE feed-forward + residual ------------
    z2 = _layernorm(h1, ln2_g_ref[...], ln2_b_ref[...])
    z2b = z2.astype(bf16)

    logits = jnp.dot(z2b, sw_ref[...], preferred_element_type=f32) + sb_ref[...]
    logits = logits - jnp.max(logits, axis=-1, keepdims=True)
    ex = jnp.exp(logits)
    route_prob = ex / jnp.sum(ex, axis=-1, keepdims=True)       # exact div (routing parity)
    rmax = jnp.max(route_prob, axis=-1, keepdims=True)          # [Tt, 1]

    # argmax with first-tie-wins semantics (matches torch.max / jnp.argmax)
    eidx = jax.lax.broadcasted_iota(jnp.int32, (Tt, E), 1)
    routes = jnp.min(jnp.where(route_prob == rmax, eidx, E),
                     axis=-1, keepdims=True)                    # [Tt, 1] int32

    acc = jnp.zeros((Tt, D), f32)
    for e in range(E):                                          # dense + select (small E)
        h_ff = jnp.maximum(
            jnp.dot(z2b, w1_ref[e], preferred_element_type=f32)
            + b1_ref[e:e + 1, :], 0.0)
        y = jnp.dot(h_ff.astype(bf16), w2_ref[e],
                    preferred_element_type=f32) + b2_ref[e:e + 1, :]
        acc = acc + jnp.where(routes == e, y, 0.0)

    out_ref[...] = h1 + acc * rmax                              # is_scale_prob=True
    rp_ref[...] = route_prob


def _pick_batches_per_tile(B, S):
    # biggest divisor of B such that a tile has ~128 token rows and the token
    # tile is sublane-aligned (or is the full token array)
    for bt in range(min(B, max(1, 128 // max(S, 1))), 0, -1):
        if B % bt == 0 and ((bt * S) % 8 == 0 or bt == B):
            return bt
    return B


# ---------------------------------------------------------------------------
# Wrapper: parameter prep (bf16 weights, scale folding), token layout, pallas_call
# ---------------------------------------------------------------------------
def switch_transformer_layer(x_sbd, mask_ss, P, H, Dk, E, F):
    S, B, D = x_sbd.shape
    f32, bf16 = jnp.float32, jnp.bfloat16
    scale = 1.0 / math.sqrt(Dk)

    Bt = _pick_batches_per_tile(B, S)
    Tt = Bt * S
    nbt = B // Bt

    # torch layout [S,B,D] -> batch-major token slab [B*S, D]
    x_tok = jnp.transpose(x_sbd, (1, 0, 2)).reshape(B * S, D).astype(f32)

    # resident additive attention bias (0 keep / -1e9 masked), shared across batch
    bias = jnp.where(mask_ss == 0.0, -MASK_BIG, 0.0).astype(f32)       # [S, S]

    # fused QKV weight (torch nn.Linear weight is [out, in]); 1/sqrt(Dk) folded into Q
    wqkv_t = jnp.concatenate([P['wq'].T * scale, P['wk'].T, P['wv'].T],
                             axis=1).astype(bf16)                      # [D, 3D]
    bqkv = jnp.concatenate([P['bq'] * scale, P['bk'], P['bv']]
                           ).reshape(1, 3 * D).astype(f32)
    wo_t = P['wo'].T.astype(bf16)                                      # [D, D]
    bo = P['bo'].reshape(1, D).astype(f32)
    ln1g = P['ln1_g'].reshape(1, D).astype(f32)
    ln1b = P['ln1_b'].reshape(1, D).astype(f32)
    ln2g = P['ln2_g'].reshape(1, D).astype(f32)
    ln2b = P['ln2_b'].reshape(1, D).astype(f32)
    sw_t = P['sw'].T.astype(bf16)                                      # [D, E]
    sb = P['sb'].reshape(1, E).astype(f32)
    w1t = jnp.transpose(P['w1'], (0, 2, 1)).astype(bf16)               # [E, D, F]
    w2t = jnp.transpose(P['w2'], (0, 2, 1)).astype(bf16)               # [E, F, D]
    b1 = P['b1'].astype(f32)
    b2 = P['b2'].astype(f32)

    weights = (ln1g, ln1b, wqkv_t, bqkv, wo_t, bo,
               ln2g, ln2b, sw_t, sb, w1t, b1, w2t, b2)

    def resident(arr):
        nd = arr.ndim
        return pl.BlockSpec(arr.shape, lambda i, _nd=nd: (0,) * _nd)

    in_specs = [
        pl.BlockSpec((Tt, D), lambda i: (i, 0)),          # token slab
        pl.BlockSpec((S, S), lambda i: (0, 0)),           # attention bias (resident)
    ] + [resident(a) for a in weights]

    out_specs = (
        pl.BlockSpec((Tt, D), lambda i: (i, 0)),          # x_out tokens
        pl.BlockSpec((Tt, E), lambda i: (i, 0)),          # route_prob
    )
    out_shape = (
        jax.ShapeDtypeStruct((B * S, D), f32),
        jax.ShapeDtypeStruct((B * S, E), f32),
    )

    flops = (B * S * (2 * D * 3 * D)                       # QKV
             + B * H * S * S * 4 * Dk                      # scores + PV
             + B * S * 2 * D * D                           # output proj
             + B * S * 2 * D * E                           # router
             + E * B * S * 4 * D * F)                      # dense experts
    transcendentals = B * H * S * S + B * S * E
    bytes_accessed = (int(x_tok.size) * 4
                      + sum(int(a.size) * a.dtype.itemsize for a in weights)
                      + int(bias.size) * 4
                      + 4 * (B * S * D + B * S * E))

    kernel = functools.partial(switch_layer_kernel, n_heads=H, d_k=Dk,
                               batches_per_tile=Bt, seq_len=S)

    out_tok, rp_tok = pl.pallas_call(
        kernel,
        grid=(nbt,),
        in_specs=in_specs,
        out_specs=out_specs,
        out_shape=out_shape,
        compiler_params=pltpu.CompilerParams(
            dimension_semantics=("parallel",),        # shards token tiles across TCs
            # 128 MiB physical on v5e/v6e; cap lower (~48 MiB) on v7x (64 MiB VMEM)
            vmem_limit_bytes=64 * 1024 * 1024),
        cost_estimate=pl.CostEstimate(flops=flops,
                                      transcendentals=transcendentals,
                                      bytes_accessed=bytes_accessed),
    )(x_tok, bias, *weights)

    # back to torch layout [S, B, D]
    x_out = jnp.transpose(out_tok.reshape(B, S, D), (1, 0, 2))
    # torch flattens tokens seq-major (index = s*B + b)
    rp_sb = jnp.transpose(rp_tok.reshape(B, S, E), (1, 0, 2)).reshape(S * B, E)
    route_prob_max = jnp.max(rp_sb, axis=-1)
    routes = jnp.argmax(rp_sb, axis=-1)                   # same first-tie-wins as kernel
    counts = jnp.sum(jax.nn.one_hot(routes, E, dtype=jnp.float32), axis=0)
    rsum = jnp.sum(rp_sb, axis=0)
    n_dropped = 0                                         # drop_tokens=False
    return x_out, counts, rsum, n_dropped, route_prob_max


# ---------------------------------------------------------------------------
# Pure-JAX reference (mirrors the PyTorch forward, torch layout [S, B, D]).
# Uses the same bf16 matmul-operand casts as the kernel.
# ---------------------------------------------------------------------------
def reference_forward(x, mask, P, H, Dk, E):
    S, B, D = x.shape
    f32, bf16 = jnp.float32, jnp.bfloat16

    def bdot(a, b):
        return jnp.dot(a.astype(bf16), b.astype(bf16), preferred_element_type=f32)

    def ln(v, g, b):
        mu = v.mean(-1, keepdims=True)
        var = ((v - mu) ** 2).mean(-1, keepdims=True)
        return (v - mu) / jnp.sqrt(var + LN_EPS) * g + b

    z = ln(x, P['ln1_g'], P['ln1_b'])
    zf = z.reshape(S * B, D)
    q = (bdot(zf, P['wq'].T) + P['bq']).reshape(S, B, H, Dk)
    k = (bdot(zf, P['wk'].T) + P['bk']).reshape(S, B, H, Dk)
    v = (bdot(zf, P['wv'].T) + P['bv']).reshape(S, B, H, Dk)
    scores = jnp.einsum('ibhd,jbhd->ijbh', q.astype(bf16), k.astype(bf16),
                        preferred_element_type=f32) / jnp.sqrt(Dk)
    scores = jnp.where(mask[..., None] == 0.0, NEG_INF, scores)
    attn = jax.nn.softmax(scores, axis=1)
    o = jnp.einsum('ijbh,jbhd->ibhd', attn.astype(bf16), v.astype(bf16),
                   preferred_element_type=f32).reshape(S * B, D)
    attn_out = bdot(o, P['wo'].T) + P['bo']
    x1 = x + attn_out.reshape(S, B, D)

    z2 = ln(x1, P['ln2_g'], P['ln2_b'])
    zf2 = z2.reshape(S * B, D)
    logits = bdot(zf2, P['sw'].T) + P['sb']
    rp = jax.nn.softmax(logits, axis=-1)
    rmax = rp.max(-1)
    routes = rp.argmax(-1)
    out = jnp.zeros_like(zf2)
    for e in range(E):
        hh = jnp.maximum(bdot(zf2, P['w1'][e].T) + P['b1'][e], 0.0)
        y = bdot(hh, P['w2'][e].T) + P['b2'][e]
        out = out + jnp.where((routes == e)[:, None], y, 0.0)
    final = out * rmax[:, None]
    x2 = x1 + final.reshape(S, B, D)
    counts = jnp.sum(jax.nn.one_hot(routes, E, dtype=jnp.float32), axis=0)
    return x2, counts, rp.sum(0), 0, rmax, rp


def init_params(key, D, H, Dk, E, F):
    ks = jax.random.split(key, 20)
    n = lambda k, s, sc=0.1: jax.random.normal(k, s, jnp.float32) * sc
    return dict(
        ln1_g=1.0 + n(ks[0], (D,), 0.05), ln1_b=n(ks[1], (D,), 0.05),
        ln2_g=1.0 + n(ks[2], (D,), 0.05), ln2_b=n(ks[3], (D,), 0.05),
        wq=n(ks[4], (D, D)), bq=n(ks[5], (D,), 0.02),
        wk=n(ks[6], (D, D)), bk=n(ks[7], (D,), 0.02),
        wv=n(ks[8], (D, D)), bv=n(ks[9], (D,), 0.02),
        wo=n(ks[10], (D, D)), bo=n(ks[11], (D,), 0.02),
        sw=n(ks[12], (E, D)), sb=n(ks[13], (E,), 0.02),
        w1=n(ks[14], (E, F, D)), b1=n(ks[15], (E, F), 0.02),
        w2=n(ks[16], (E, D, F)), b2=n(ks[17], (E, D), 0.02),
    )


if __name__ == "__main__":
    S, B, D = 8, 2, 32
    H, Dk = 4, 8
    E, F = 4, 64

    key = jax.random.PRNGKey(0)
    kx, kp = jax.random.split(key)
    x = jax.random.normal(kx, (S, B, D), jnp.float32)
    # causal mask [Sq, Sk]: 1 = attend, 0 = masked (shared across batch)
    causal = jnp.tril(jnp.ones((S, S), jnp.float32))
    P = init_params(kp, D, H, Dk, E, F)

    out = switch_transformer_layer(x, causal, P, H, Dk, E, F)
    out = jax.block_until_ready(out)
    x_out, counts, rsum, n_dropped, rmax = out

    # ---- sanity check against pure-JAX reference (same bf16 operand casts) ----
    mask_b = jnp.broadcast_to(causal[:, :, None], (S, S, B))
    rx, rc, rs, rn, rm, rp = reference_forward(x, mask_b, P, H, Dk, E)
    assert x_out.shape == (S, B, D)
    assert counts.shape == (E,) and rsum.shape == (E,) and rmax.shape == (S * B,)
    assert n_dropped == 0

    # Tokens whose top-2 routing gap is large cannot have their argmax flipped by
    # bf16 / rounding noise; compare strictly on those.
    top2 = jnp.sort(rp, axis=-1)[:, -2:]
    gap = top2[:, 1] - top2[:, 0]                               # [S*B], token = s*B+b
    safe = gap > 1e-2
    n_unsafe = int(jnp.sum(~safe))
    safe_sbd = safe.reshape(S, B)[:, :, None]

    rel_err = jnp.where(safe_sbd, jnp.abs(x_out - rx) / (jnp.abs(rx) + 1.0), 0.0)
    assert float(jnp.max(rel_err)) < 5e-2
    assert float(jnp.sum(jnp.abs(counts - rc))) <= 2.0 * n_unsafe + 1e-6
    assert jnp.allclose(rsum, rs, atol=5e-2, rtol=5e-2)
    assert jnp.allclose(rmax, rm, atol=3e-2, rtol=3e-2)

    print("KERNEL_OK")
</pallas_src>

<mosaic_0001>
module attributes {stable_mosaic.version = 11 : i64} {
  func.func @switch_layer_kernel(%arg0: i32, %arg1: memref<16x32xf32, #tpu.memory_space<vmem>>, %arg2: memref<8x8xf32, #tpu.memory_space<vmem>>, %arg3: memref<1x32xf32, #tpu.memory_space<vmem>>, %arg4: memref<1x32xf32, #tpu.memory_space<vmem>>, %arg5: memref<32x96xbf16, #tpu.memory_space<vmem>>, %arg6: memref<1x96xf32, #tpu.memory_space<vmem>>, %arg7: memref<32x32xbf16, #tpu.memory_space<vmem>>, %arg8: memref<1x32xf32, #tpu.memory_space<vmem>>, %arg9: memref<1x32xf32, #tpu.memory_space<vmem>>, %arg10: memref<1x32xf32, #tpu.memory_space<vmem>>, %arg11: memref<32x4xbf16, #tpu.memory_space<vmem>>, %arg12: memref<1x4xf32, #tpu.memory_space<vmem>>, %arg13: memref<4x32x64xbf16, #tpu.memory_space<vmem>>, %arg14: memref<4x64xf32, #tpu.memory_space<vmem>>, %arg15: memref<4x64x32xbf16, #tpu.memory_space<vmem>>, %arg16: memref<4x32xf32, #tpu.memory_space<vmem>>, %arg17: memref<16x32xf32, #tpu.memory_space<vmem>>, %arg18: memref<16x4xf32, #tpu.memory_space<vmem>>) attributes {dimension_semantics = [#tpu.dimension_semantics<parallel>], iteration_bounds = array<i64: 1>, scalar_prefetch = 0 : i64, scratch_operands = 0 : i64, tpu.core_type = #tpu.core_type<tc>, window_params = [{transform_indices = @transform_0, window_bounds = array<i64: 16, 32>}, {pipeline_mode = #tpu.pipeline_mode<synchronous>, transform_indices = @transform_1, window_bounds = array<i64: 8, 8>}, {pipeline_mode = #tpu.pipeline_mode<synchronous>, transform_indices = @transform_2, window_bounds = array<i64: 1, 32>}, {pipeline_mode = #tpu.pipeline_mode<synchronous>, transform_indices = @transform_3, window_bounds = array<i64: 1, 32>}, {pipeline_mode = #tpu.pipeline_mode<synchronous>, transform_indices = @transform_4, window_bounds = array<i64: 32, 96>}, {pipeline_mode = #tpu.pipeline_mode<synchronous>, transform_indices = @transform_5, window_bounds = array<i64: 1, 96>}, {pipeline_mode = #tpu.pipeline_mode<synchronous>, transform_indices = @transform_6, window_bounds = array<i64: 32, 32>}, {pipeline_mode = #tpu.pipeline_mode<synchronous>, transform_indices = @transform_7, window_bounds = array<i64: 1, 32>}, {pipeline_mode = #tpu.pipeline_mode<synchronous>, transform_indices = @transform_8, window_bounds = array<i64: 1, 32>}, {pipeline_mode = #tpu.pipeline_mode<synchronous>, transform_indices = @transform_9, window_bounds = array<i64: 1, 32>}, {pipeline_mode = #tpu.pipeline_mode<synchronous>, transform_indices = @transform_10, window_bounds = array<i64: 32, 4>}, {pipeline_mode = #tpu.pipeline_mode<synchronous>, transform_indices = @transform_11, window_bounds = array<i64: 1, 4>}, {pipeline_mode = #tpu.pipeline_mode<synchronous>, transform_indices = @transform_12, window_bounds = array<i64: 4, 32, 64>}, {pipeline_mode = #tpu.pipeline_mode<synchronous>, transform_indices = @transform_13, window_bounds = array<i64: 4, 64>}, {pipeline_mode = #tpu.pipeline_mode<synchronous>, transform_indices = @transform_14, window_bounds = array<i64: 4, 64, 32>}, {pipeline_mode = #tpu.pipeline_mode<synchronous>, transform_indices = @transform_15, window_bounds = array<i64: 4, 32>}, {transform_indices = @transform_16, window_bounds = array<i64: 16, 32>}, {transform_indices = @transform_17, window_bounds = array<i64: 16, 4>}]} {
    %c0 = arith.constant 0 : index
    %c0_0 = arith.constant 0 : index
    %0 = vector.load %arg1[%c0, %c0_0] : memref<16x32xf32, #tpu.memory_space<vmem>>, vector<16x32xf32>
    %c0_1 = arith.constant 0 : index
    %c0_2 = arith.constant 0 : index
    %1 = vector.load %arg3[%c0_1, %c0_2] : memref<1x32xf32, #tpu.memory_space<vmem>>, vector<1x32xf32>
    %c0_3 = arith.constant 0 : index
    %c0_4 = arith.constant 0 : index
    %2 = vector.load %arg4[%c0_3, %c0_4] : memref<1x32xf32, #tpu.memory_space<vmem>>, vector<1x32xf32>
    %cst = arith.constant dense<0.000000e+00> : vector<16xf32>
    %3 = vector.multi_reduction <add>, %0, %cst [1] : vector<16x32xf32> to vector<16xf32>
    %4 = vector.shape_cast %3 : vector<16xf32> to vector<16x1xf32>
    %cst_5 = arith.constant 3.200000e+01 : f32
    %5 = vector.broadcast %cst_5 : f32 to vector<16x1xf32>
    %6 = arith.divf %4, %5 : vector<16x1xf32>
    %7 = vector.broadcast %6 : vector<16x1xf32> to vector<16x32xf32>
    %8 = arith.subf %0, %7 : vector<16x32xf32>
    %9 = arith.mulf %8, %8 : vector<16x32xf32>
    %cst_6 = arith.constant dense<0.000000e+00> : vector<16xf32>
    %10 = vector.multi_reduction <add>, %9, %cst_6 [1] : vector<16x32xf32> to vector<16xf32>
    %11 = vector.shape_cast %10 : vector<16xf32> to vector<16x1xf32>
    %cst_7 = arith.constant 3.200000e+01 : f32
    %12 = vector.broadcast %cst_7 : f32 to vector<16x1xf32>
    %13 = arith.divf %11, %12 : vector<16x1xf32>
    %14 = vector.broadcast %6 : vector<16x1xf32> to vector<16x32xf32>
    %15 = arith.subf %0, %14 : vector<16x32xf32>
    %cst_8 = arith.constant 9.99999974E-6 : f32
    %16 = vector.broadcast %cst_8 : f32 to vector<16x1xf32>
    %17 = arith.addf %13, %16 : vector<16x1xf32>
    %18 = math.rsqrt %17 : vector<16x1xf32>
    %19 = vector.broadcast %18 : vector<16x1xf32> to vector<16x32xf32>
    %20 = arith.mulf %15, %19 : vector<16x32xf32>
    %21 = vector.broadcast %1 : vector<1x32xf32> to vector<16x32xf32>
    %22 = arith.mulf %20, %21 : vector<16x32xf32>
    %23 = vector.broadcast %2 : vector<1x32xf32> to vector<16x32xf32>
    %24 = arith.addf %22, %23 : vector<16x32xf32>
    %25 = arith.truncf %24 : vector<16x32xf32> to vector<16x32xbf16>
    %c0_9 = arith.constant 0 : index
    %c0_10 = arith.constant 0 : index
    %26 = vector.load %arg5[%c0_9, %c0_10] : memref<32x96xbf16, #tpu.memory_space<vmem>>, vector<32x96xbf16>
    %cst_11 = arith.constant dense<0.000000e+00> : vector<16x96xf32>
    %27 = tpu.matmul %25, %26, %cst_11 {dimension_numbers = #tpu.dot_dimension_numbers<[1], [0], [0], [1], [0, 0, 1, 1], [], []>} : vector<16x32xbf16>, vector<32x96xbf16>, vector<16x96xf32> -> vector<16x96xf32>
    %c0_12 = arith.constant 0 : index
    %c0_13 = arith.constant 0 : index
    %28 = vector.load %arg6[%c0_12, %c0_13] : memref<1x96xf32, #tpu.memory_space<vmem>>, vector<1x96xf32>
    %29 = vector.broadcast %28 : vector<1x96xf32> to vector<16x96xf32>
    %30 = arith.addf %27, %29 : vector<16x96xf32>
    %31 = vector.extract_strided_slice %30 {offsets = [0, 0], sizes = [16, 32], strides = [1, 1]} : vector<16x96xf32> to vector<16x32xf32>
    %32 = vector.extract_strided_slice %30 {offsets = [0, 32], sizes = [16, 32], strides = [1, 1]} : vector<16x96xf32> to vector<16x32xf32>
    %33 = vector.extract_strided_slice %30 {offsets = [0, 64], sizes = [16, 32], strides = [1, 1]} : vector<16x96xf32> to vector<16x32xf32>
    %c0_14 = arith.constant 0 : index
    %c0_15 = arith.constant 0 : index
    %34 = vector.load %arg2[%c0_14, %c0_15] : memref<8x8xf32, #tpu.memory_space<vmem>>, vector<8x8xf32>
    %35 = vector.extract_strided_slice %31 {offsets = [0, 0], sizes = [8, 32], strides = [1, 1]} : vector<16x32xf32> to vector<8x32xf32>
    %36 = vector.shape_cast %35 : vector<8x32xf32> to vector<8x4x8xf32>
    %37 = arith.truncf %36 : vector<8x4x8xf32> to vector<8x4x8xbf16>
    %38 = vector.extract_strided_slice %32 {offsets = [0, 0], sizes = [8, 32], strides = [1, 1]} : vector<16x32xf32> to vector<8x32xf32>
    %39 = vector.shape_cast %38 : vector<8x32xf32> to vector<8x4x8xf32>
    %40 = arith.truncf %39 : vector<8x4x8xf32> to vector<8x4x8xbf16>
    %41 = vector.extract_strided_slice %33 {offsets = [0, 0], sizes = [8, 32], strides = [1, 1]} : vector<16x32xf32> to vector<8x32xf32>
    %42 = vector.shape_cast %41 : vector<8x32xf32> to vector<8x4x8xf32>
    %43 = arith.truncf %42 : vector<8x4x8xf32> to vector<8x4x8xbf16>
    "tpu.trace_start"() <{level = 10 : i32, message = "qhd,khd->hqk"}> : () -> ()
    %cst_16 = arith.constant dense<0.000000e+00> : vector<4x8x8xf32>
    %44 = tpu.matmul %37, %40, %cst_16 {dimension_numbers = #tpu.dot_dimension_numbers<[2], [2], [0], [0], [0, 1, 0, 0, 1, 0], [1], [1]>} : vector<8x4x8xbf16>, vector<8x4x8xbf16>, vector<4x8x8xf32> -> vector<4x8x8xf32>
    "tpu.trace_stop"() : () -> ()
    %45 = vector.shape_cast %34 : vector<8x8xf32> to vector<1x8x8xf32>
    %46 = vector.broadcast %45 : vector<1x8x8xf32> to vector<4x8x8xf32>
    %47 = arith.addf %44, %46 : vector<4x8x8xf32>
    %cst_17 = arith.constant dense<0xFF800000> : vector<4x8xf32>
    %48 = vector.multi_reduction <maximumf>, %47, %cst_17 [2] : vector<4x8x8xf32> to vector<4x8xf32>
    %49 = vector.shape_cast %48 : vector<4x8xf32> to vector<4x8x1xf32>
    %50 = vector.broadcast %49 : vector<4x8x1xf32> to vector<4x8x8xf32>
    %51 = arith.subf %47, %50 : vector<4x8x8xf32>
    %52 = math.exp %51 : vector<4x8x8xf32>
    %cst_18 = arith.constant dense<0.000000e+00> : vector<4x8xf32>
    %53 = vector.multi_reduction <add>, %52, %cst_18 [2] : vector<4x8x8xf32> to vector<4x8xf32>
    %54 = vector.shape_cast %53 : vector<4x8xf32> to vector<4x8x1xf32>
    %55 = arith.truncf %52 : vector<4x8x8xf32> to vector<4x8x8xbf16>
    "tpu.trace_start"() <{level = 10 : i32, message = "hqk,khd->hqd"}> : () -> ()
    %cst_19 = arith.constant dense<0.000000e+00> : vector<4x8x8xf32>
    %56 = tpu.matmul %55, %43, %cst_19 {dimension_numbers = #tpu.dot_dimension_numbers<[2], [0], [1], [2], [0, 0, 0, 1, 1, 2], [0], [1]>} : vector<4x8x8xbf16>, vector<8x4x8xbf16>, vector<4x8x8xf32> -> vector<4x8x8xf32>
    "tpu.trace_stop"() : () -> ()
    %57 = tpu.reciprocal %54 {approx = true} : vector<4x8x1xf32> -> vector<4x8x1xf32>
    %58 = vector.broadcast %57 : vector<4x8x1xf32> to vector<4x8x8xf32>
    %59 = arith.mulf %56, %58 : vector<4x8x8xf32>
    %60 = tpu.transpose %59, [1, 0, 2] : vector<4x8x8xf32> -> vector<8x4x8xf32>
    %61 = vector.shape_cast %60 : vector<8x4x8xf32> to vector<8x32xf32>
    %62 = vector.extract_strided_slice %31 {offsets = [8, 0], sizes = [8, 32], strides = [1, 1]} : vector<16x32xf32> to vector<8x32xf32>
    %63 = vector.shape_cast %62 : vector<8x32xf32> to vector<8x4x8xf32>
    %64 = arith.truncf %63 : vector<8x4x8xf32> to vector<8x4x8xbf16>
    %65 = vector.extract_strided_slice %32 {offsets = [8, 0], sizes = [8, 32], strides = [1, 1]} : vector<16x32xf32> to vector<8x32xf32>
    %66 = vector.shape_cast %65 : vector<8x32xf32> to vector<8x4x8xf32>
    %67 = arith.truncf %66 : vector<8x4x8xf32> to vector<8x4x8xbf16>
    %68 = vector.extract_strided_slice %33 {offsets = [8, 0], sizes = [8, 32], strides = [1, 1]} : vector<16x32xf32> to vector<8x32xf32>
    %69 = vector.shape_cast %68 : vector<8x32xf32> to vector<8x4x8xf32>
    %70 = arith.truncf %69 : vector<8x4x8xf32> to vector<8x4x8xbf16>
    "tpu.trace_start"() <{level = 10 : i32, message = "qhd,khd->hqk"}> : () -> ()
    %cst_20 = arith.constant dense<0.000000e+00> : vector<4x8x8xf32>
    %71 = tpu.matmul %64, %67, %cst_20 {dimension_numbers = #tpu.dot_dimension_numbers<[2], [2], [0], [0], [0, 1, 0, 0, 1, 0], [1], [1]>} : vector<8x4x8xbf16>, vector<8x4x8xbf16>, vector<4x8x8xf32> -> vector<4x8x8xf32>
    "tpu.trace_stop"() : () -> ()
    %72 = vector.shape_cast %34 : vector<8x8xf32> to vector<1x8x8xf32>
    %73 = vector.broadcast %72 : vector<1x8x8xf32> to vector<4x8x8xf32>
    %74 = arith.addf %71, %73 : vector<4x8x8xf32>
    %cst_21 = arith.constant dense<0xFF800000> : vector<4x8xf32>
    %75 = vector.multi_reduction <maximumf>, %74, %cst_21 [2] : vector<4x8x8xf32> to vector<4x8xf32>
    %76 = vector.shape_cast %75 : vector<4x8xf32> to vector<4x8x1xf32>
    %77 = vector.broadcast %76 : vector<4x8x1xf32> to vector<4x8x8xf32>
    %78 = arith.subf %74, %77 : vector<4x8x8xf32>
    %79 = math.exp %78 : vector<4x8x8xf32>
    %cst_22 = arith.constant dense<0.000000e+00> : vector<4x8xf32>
    %80 = vector.multi_reduction <add>, %79, %cst_22 [2] : vector<4x8x8xf32> to vector<4x8xf32>
    %81 = vector.shape_cast %80 : vector<4x8xf32> to vector<4x8x1xf32>
    %82 = arith.truncf %79 : vector<4x8x8xf32> to vector<4x8x8xbf16>
    "tpu.trace_start"() <{level = 10 : i32, message = "hqk,khd->hqd"}> : () -> ()
    %cst_23 = arith.constant dense<0.000000e+00> : vector<4x8x8xf32>
    %83 = tpu.matmul %82, %70, %cst_23 {dimension_numbers = #tpu.dot_dimension_numbers<[2], [0], [1], [2], [0, 0, 0, 1, 1, 2], [0], [1]>} : vector<4x8x8xbf16>, vector<8x4x8xbf16>, vector<4x8x8xf32> -> vector<4x8x8xf32>
    "tpu.trace_stop"() : () -> ()
    %84 = tpu.reciprocal %81 {approx = true} : vector<4x8x1xf32> -> vector<4x8x1xf32>
    %85 = vector.broadcast %84 : vector<4x8x1xf32> to vector<4x8x8xf32>
    %86 = arith.mulf %83, %85 : vector<4x8x8xf32>
    %87 = tpu.transpose %86, [1, 0, 2] : vector<4x8x8xf32> -> vector<8x4x8xf32>
    %88 = vector.shape_cast %87 : vector<8x4x8xf32> to vector<8x32xf32>
    %89 = tpu.concatenate %61, %88 in 0 : vector<8x32xf32>, vector<8x32xf32> -> vector<16x32xf32>
    %90 = arith.truncf %89 : vector<16x32xf32> to vector<16x32xbf16>
    %c0_24 = arith.constant 0 : index
    %c0_25 = arith.constant 0 : index
    %91 = vector.load %arg7[%c0_24, %c0_25] : memref<32x32xbf16, #tpu.memory_space<vmem>>, vector<32x32xbf16>
    %cst_26 = arith.constant dense<0.000000e+00> : vector<16x32xf32>
    %92 = tpu.matmul %90, %91, %cst_26 {dimension_numbers = #tpu.dot_dimension_numbers<[1], [0], [0], [1], [0, 0, 1, 1], [], []>} : vector<16x32xbf16>, vector<32x32xbf16>, vector<16x32xf32> -> vector<16x32xf32>
    %c0_27 = arith.constant 0 : index
    %c0_28 = arith.constant 0 : index
    %93 = vector.load %arg8[%c0_27, %c0_28] : memref<1x32xf32, #tpu.memory_space<vmem>>, vector<1x32xf32>
    %94 = vector.broadcast %93 : vector<1x32xf32> to vector<16x32xf32>
    %95 = arith.addf %92, %94 : vector<16x32xf32>
    %96 = arith.addf %0, %95 : vector<16x32xf32>
    %c0_29 = arith.constant 0 : index
    %c0_30 = arith.constant 0 : index
    %97 = vector.load %arg9[%c0_29, %c0_30] : memref<1x32xf32, #tpu.memory_space<vmem>>, vector<1x32xf32>
    %c0_31 = arith.constant 0 : index
    %c0_32 = arith.constant 0 : index
    %98 = vector.load %arg10[%c0_31, %c0_32] : memref<1x32xf32, #tpu.memory_space<vmem>>, vector<1x32xf32>
    %cst_33 = arith.constant dense<0.000000e+00> : vector<16xf32>
    %99 = vector.multi_reduction <add>, %96, %cst_33 [1] : vector<16x32xf32> to vector<16xf32>
    %100 = vector.shape_cast %99 : vector<16xf32> to vector<16x1xf32>
    %cst_34 = arith.constant 3.200000e+01 : f32
    %101 = vector.broadcast %cst_34 : f32 to vector<16x1xf32>
    %102 = arith.divf %100, %101 : vector<16x1xf32>
    %103 = vector.broadcast %102 : vector<16x1xf32> to vector<16x32xf32>
    %104 = arith.subf %96, %103 : vector<16x32xf32>
    %105 = arith.mulf %104, %104 : vector<16x32xf32>
    %cst_35 = arith.constant dense<0.000000e+00> : vector<16xf32>
    %106 = vector.multi_reduction <add>, %105, %cst_35 [1] : vector<16x32xf32> to vector<16xf32>
    %107 = vector.shape_cast %106 : vector<16xf32> to vector<16x1xf32>
    %cst_36 = arith.constant 3.200000e+01 : f32
    %108 = vector.broadcast %cst_36 : f32 to vector<16x1xf32>
    %109 = arith.divf %107, %108 : vector<16x1xf32>
    %110 = vector.broadcast %102 : vector<16x1xf32> to vector<16x32xf32>
    %111 = arith.subf %96, %110 : vector<16x32xf32>
    %cst_37 = arith.constant 9.99999974E-6 : f32
    %112 = vector.broadcast %cst_37 : f32 to vector<16x1xf32>
    %113 = arith.addf %109, %112 : vector<16x1xf32>
    %114 = math.rsqrt %113 : vector<16x1xf32>
    %115 = vector.broadcast %114 : vector<16x1xf32> to vector<16x32xf32>
    %116 = arith.mulf %111, %115 : vector<16x32xf32>
    %117 = vector.broadcast %97 : vector<1x32xf32> to vector<16x32xf32>
    %118 = arith.mulf %116, %117 : vector<16x32xf32>
    %119 = vector.broadcast %98 : vector<1x32xf32> to vector<16x32xf32>
    %120 = arith.addf %118, %119 : vector<16x32xf32>
    %121 = arith.truncf %120 : vector<16x32xf32> to vector<16x32xbf16>
    %c0_38 = arith.constant 0 : index
    %c0_39 = arith.constant 0 : index
    %122 = vector.load %arg11[%c0_38, %c0_39] : memref<32x4xbf16, #tpu.memory_space<vmem>>, vector<32x4xbf16>
    %cst_40 = arith.constant dense<0.000000e+00> : vector<16x4xf32>
    %123 = tpu.matmul %121, %122, %cst_40 {dimension_numbers = #tpu.dot_dimension_numbers<[1], [0], [0], [1], [0, 0, 1, 1], [], []>} : vector<16x32xbf16>, vector<32x4xbf16>, vector<16x4xf32> -> vector<16x4xf32>
    %c0_41 = arith.constant 0 : index
    %c0_42 = arith.constant 0 : index
    %124 = vector.load %arg12[%c0_41, %c0_42] : memref<1x4xf32, #tpu.memory_space<vmem>>, vector<1x4xf32>
    %125 = vector.broadcast %124 : vector<1x4xf32> to vector<16x4xf32>
    %126 = arith.addf %123, %125 : vector<16x4xf32>
    %cst_43 = arith.constant dense<0xFF800000> : vector<16xf32>
    %127 = vector.multi_reduction <maximumf>, %126, %cst_43 [1] : vector<16x4xf32> to vector<16xf32>
    %128 = vector.shape_cast %127 : vector<16xf32> to vector<16x1xf32>
    %129 = vector.broadcast %128 : vector<16x1xf32> to vector<16x4xf32>
    %130 = arith.subf %126, %129 : vector<16x4xf32>
    %131 = math.exp %130 : vector<16x4xf32>
    %cst_44 = arith.constant dense<0.000000e+00> : vector<16xf32>
    %132 = vector.multi_reduction <add>, %131, %cst_44 [1] : vector<16x4xf32> to vector<16xf32>
    %133 = vector.shape_cast %132 : vector<16xf32> to vector<16x1xf32>
    %134 = vector.broadcast %133 : vector<16x1xf32> to vector<16x4xf32>
    %135 = arith.divf %131, %134 : vector<16x4xf32>
    %cst_45 = arith.constant dense<0xFF800000> : vector<16xf32>
    %136 = vector.multi_reduction <maximumf>, %135, %cst_45 [1] : vector<16x4xf32> to vector<16xf32>
    %137 = vector.shape_cast %136 : vector<16xf32> to vector<16x1xf32>
    %138 = tpu.iota {dimensions = array<i32: 1>} : vector<16x4xi32>
    %139 = vector.broadcast %137 : vector<16x1xf32> to vector<16x4xf32>
    %140 = arith.cmpf oeq, %135, %139 : vector<16x4xf32>
    %c4_i32 = arith.constant 4 : i32
    %141 = vector.broadcast %c4_i32 : i32 to vector<16x4xi32>
    %142 = arith.select %140, %138, %141 : vector<16x4xi1>, vector<16x4xi32>
    %cst_46 = arith.constant dense<2147483647> : vector<16xi32>
    %143 = vector.multi_reduction <minsi>, %142, %cst_46 [1] : vector<16x4xi32> to vector<16xi32>
    %144 = vector.shape_cast %143 : vector<16xi32> to vector<16x1xi32>
    %cst_47 = arith.constant 0.000000e+00 : f32
    %145 = vector.broadcast %cst_47 : f32 to vector<16x32xf32>
    %c0_48 = arith.constant 0 : index
    %c0_49 = arith.constant 0 : index
    %c0_50 = arith.constant 0 : index
    %146 = vector.load %arg13[%c0_48, %c0_49, %c0_50] : memref<4x32x64xbf16, #tpu.memory_space<vmem>>, vector<1x32x64xbf16>
    %147 = vector.shape_cast %146 : vector<1x32x64xbf16> to vector<32x64xbf16>
    %cst_51 = arith.constant dense<0.000000e+00> : vector<16x64xf32>
    %148 = tpu.matmul %121, %147, %cst_51 {dimension_numbers = #tpu.dot_dimension_numbers<[1], [0], [0], [1], [0, 0, 1, 1], [], []>} : vector<16x32xbf16>, vector<32x64xbf16>, vector<16x64xf32> -> vector<16x64xf32>
    %c0_52 = arith.constant 0 : index
    %c0_53 = arith.constant 0 : index
    %149 = vector.load %arg14[%c0_52, %c0_53] : memref<4x64xf32, #tpu.memory_space<vmem>>, vector<1x64xf32>
    %150 = vector.broadcast %149 : vector<1x64xf32> to vector<16x64xf32>
    %151 = arith.addf %148, %150 : vector<16x64xf32>
    %cst_54 = arith.constant 0.000000e+00 : f32
    %152 = vector.broadcast %cst_54 : f32 to vector<16x64xf32>
    %153 = arith.maximumf %151, %152 : vector<16x64xf32>
    %154 = arith.truncf %153 : vector<16x64xf32> to vector<16x64xbf16>
    %c0_55 = arith.constant 0 : index
    %c0_56 = arith.constant 0 : index
    %c0_57 = arith.constant 0 : index
    %155 = vector.load %arg15[%c0_55, %c0_56, %c0_57] : memref<4x64x32xbf16, #tpu.memory_space<vmem>>, vector<1x64x32xbf16>
    %156 = vector.shape_cast %155 : vector<1x64x32xbf16> to vector<64x32xbf16>
    %cst_58 = arith.constant dense<0.000000e+00> : vector<16x32xf32>
    %157 = tpu.matmul %154, %156, %cst_58 {dimension_numbers = #tpu.dot_dimension_numbers<[1], [0], [0], [1], [0, 0, 1, 1], [], []>} : vector<16x64xbf16>, vector<64x32xbf16>, vector<16x32xf32> -> vector<16x32xf32>
    %c0_59 = arith.constant 0 : index
    %c0_60 = arith.constant 0 : index
    %158 = vector.load %arg16[%c0_59, %c0_60] : memref<4x32xf32, #tpu.memory_space<vmem>>, vector<1x32xf32>
    %159 = vector.broadcast %158 : vector<1x32xf32> to vector<16x32xf32>
    %160 = arith.addf %157, %159 : vector<16x32xf32>
    %c0_i32 = arith.constant 0 : i32
    %161 = vector.broadcast %c0_i32 : i32 to vector<16x1xi32>
    %162 = arith.cmpi eq, %144, %161 : vector<16x1xi32>
    %cst_61 = arith.constant 0.000000e+00 : f32
    %163 = vector.shape_cast %162 : vector<16x1xi1> to vector<16x1xi1>
    %164 = vector.broadcast %163 : vector<16x1xi1> to vector<16x32xi1>
    %165 = vector.broadcast %cst_61 : f32 to vector<16x32xf32>
    %166 = arith.select %164, %160, %165 : vector<16x32xi1>, vector<16x32xf32>
    %167 = arith.addf %145, %166 : vector<16x32xf32>
    %c1 = arith.constant 1 : index
    %c0_62 = arith.constant 0 : index
    %c0_63 = arith.constant 0 : index
    %168 = vector.load %arg13[%c1, %c0_62, %c0_63] : memref<4x32x64xbf16, #tpu.memory_space<vmem>>, vector<1x32x64xbf16>
    %169 = vector.shape_cast %168 : vector<1x32x64xbf16> to vector<32x64xbf16>
    %cst_64 = arith.constant dense<0.000000e+00> : vector<16x64xf32>
    %170 = tpu.matmul %121, %169, %cst_64 {dimension_numbers = #tpu.dot_dimension_numbers<[1], [0], [0], [1], [0, 0, 1, 1], [], []>} : vector<16x32xbf16>, vector<32x64xbf16>, vector<16x64xf32> -> vector<16x64xf32>
    %c1_65 = arith.constant 1 : index
    %c0_66 = arith.constant 0 : index
    %171 = vector.load %arg14[%c1_65, %c0_66] : memref<4x64xf32, #tpu.memory_space<vmem>>, vector<1x64xf32>
    %172 = vector.broadcast %171 : vector<1x64xf32> to vector<16x64xf32>
    %173 = arith.addf %170, %172 : vector<16x64xf32>
    %cst_67 = arith.constant 0.000000e+00 : f32
    %174 = vector.broadcast %cst_67 : f32 to vector<16x64xf32>
    %175 = arith.maximumf %173, %174 : vector<16x64xf32>
    %176 = arith.truncf %175 : vector<16x64xf32> to vector<16x64xbf16>
    %c1_68 = arith.constant 1 : index
    %c0_69 = arith.constant 0 : index
    %c0_70 = arith.constant 0 : index
    %177 = vector.load %arg15[%c1_68, %c0_69, %c0_70] : memref<4x64x32xbf16, #tpu.memory_space<vmem>>, vector<1x64x32xbf16>
    %178 = vector.shape_cast %177 : vector<1x64x32xbf16> to vector<64x32xbf16>
    %cst_71 = arith.constant dense<0.000000e+00> : vector<16x32xf32>
    %179 = tpu.matmul %176, %178, %cst_71 {dimension_numbers = #tpu.dot_dimension_numbers<[1], [0], [0], [1], [0, 0, 1, 1], [], []>} : vector<16x64xbf16>, vector<64x32xbf16>, vector<16x32xf32> -> vector<16x32xf32>
    %c1_72 = arith.constant 1 : index
    %c0_73 = arith.constant 0 : index
    %180 = vector.load %arg16[%c1_72, %c0_73] : memref<4x32xf32, #tpu.memory_space<vmem>>, vector<1x32xf32>
    %181 = vector.broadcast %180 : vector<1x32xf32> to vector<16x32xf32>
    %182 = arith.addf %179, %181 : vector<16x32xf32>
    %c1_i32 = arith.constant 1 : i32
    %183 = vector.broadcast %c1_i32 : i32 to vector<16x1xi32>
    %184 = arith.cmpi eq, %144, %183 : vector<16x1xi32>
    %cst_74 = arith.constant 0.000000e+00 : f32
    %185 = vector.shape_cast %184 : vector<16x1xi1> to vector<16x1xi1>
    %186 = vector.broadcast %185 : vector<16x1xi1> to vector<16x32xi1>
    %187 = vector.broadcast %cst_74 : f32 to vector<16x32xf32>
    %188 = arith.select %186, %182, %187 : vector<16x32xi1>, vector<16x32xf32>
    %189 = arith.addf %167, %188 : vector<16x32xf32>
    %c2 = arith.constant 2 : index
    %c0_75 = arith.constant 0 : index
    %c0_76 = arith.constant 0 : index
    %190 = vector.load %arg13[%c2, %c0_75, %c0_76] : memref<4x32x64xbf16, #tpu.memory_space<vmem>>, vector<1x32x64xbf16>
    %191 = vector.shape_cast %190 : vector<1x32x64xbf16> to vector<32x64xbf16>
    %cst_77 = arith.constant dense<0.000000e+00> : vector<16x64xf32>
    %192 = tpu.matmul %121, %191, %cst_77 {dimension_numbers = #tpu.dot_dimension_numbers<[1], [0], [0], [1], [0, 0, 1, 1], [], []>} : vector<16x32xbf16>, vector<32x64xbf16>, vector<16x64xf32> -> vector<16x64xf32>
    %c2_78 = arith.constant 2 : index
    %c0_79 = arith.constant 0 : index
    %193 = vector.load %arg14[%c2_78, %c0_79] : memref<4x64xf32, #tpu.memory_space<vmem>>, vector<1x64xf32>
    %194 = vector.broadcast %193 : vector<1x64xf32> to vector<16x64xf32>
    %195 = arith.addf %192, %194 : vector<16x64xf32>
    %cst_80 = arith.constant 0.000000e+00 : f32
    %196 = vector.broadcast %cst_80 : f32 to vector<16x64xf32>
    %197 = arith.maximumf %195, %196 : vector<16x64xf32>
    %198 = arith.truncf %197 : vector<16x64xf32> to vector<16x64xbf16>
    %c2_81 = arith.constant 2 : index
    %c0_82 = arith.constant 0 : index
    %c0_83 = arith.constant 0 : index
    %199 = vector.load %arg15[%c2_81, %c0_82, %c0_83] : memref<4x64x32xbf16, #tpu.memory_space<vmem>>, vector<1x64x32xbf16>
    %200 = vector.shape_cast %199 : vector<1x64x32xbf16> to vector<64x32xbf16>
    %cst_84 = arith.constant dense<0.000000e+00> : vector<16x32xf32>
    %201 = tpu.matmul %198, %200, %cst_84 {dimension_numbers = #tpu.dot_dimension_numbers<[1], [0], [0], [1], [0, 0, 1, 1], [], []>} : vector<16x64xbf16>, vector<64x32xbf16>, vector<16x32xf32> -> vector<16x32xf32>
    %c2_85 = arith.constant 2 : index
    %c0_86 = arith.constant 0 : index
    %202 = vector.load %arg16[%c2_85, %c0_86] : memref<4x32xf32, #tpu.memory_space<vmem>>, vector<1x32xf32>
    %203 = vector.broadcast %202 : vector<1x32xf32> to vector<16x32xf32>
    %204 = arith.addf %201, %203 : vector<16x32xf32>
    %c2_i32 = arith.constant 2 : i32
    %205 = vector.broadcast %c2_i32 : i32 to vector<16x1xi32>
    %206 = arith.cmpi eq, %144, %205 : vector<16x1xi32>
    %cst_87 = arith.constant 0.000000e+00 : f32
    %207 = vector.shape_cast %206 : vector<16x1xi1> to vector<16x1xi1>
    %208 = vector.broadcast %207 : vector<16x1xi1> to vector<16x32xi1>
    %209 = vector.broadcast %cst_87 : f32 to vector<16x32xf32>
    %210 = arith.select %208, %204, %209 : vector<16x32xi1>, vector<16x32xf32>
    %211 = arith.addf %189, %210 : vector<16x32xf32>
    %c3 = arith.constant 3 : index
    %c0_88 = arith.constant 0 : index
    %c0_89 = arith.constant 0 : index
    %212 = vector.load %arg13[%c3, %c0_88, %c0_89] : memref<4x32x64xbf16, #tpu.memory_space<vmem>>, vector<1x32x64xbf16>
    %213 = vector.shape_cast %212 : vector<1x32x64xbf16> to vector<32x64xbf16>
    %cst_90 = arith.constant dense<0.000000e+00> : vector<16x64xf32>
    %214 = tpu.matmul %121, %213, %cst_90 {dimension_numbers = #tpu.dot_dimension_numbers<[1], [0], [0], [1], [0, 0, 1, 1], [], []>} : vector<16x32xbf16>, vector<32x64xbf16>, vector<16x64xf32> -> vector<16x64xf32>
    %c3_91 = arith.constant 3 : index
    %c0_92 = arith.constant 0 : index
    %215 = vector.load %arg14[%c3_91, %c0_92] : memref<4x64xf32, #tpu.memory_space<vmem>>, vector<1x64xf32>
    %216 = vector.broadcast %215 : vector<1x64xf32> to vector<16x64xf32>
    %217 = arith.addf %214, %216 : vector<16x64xf32>
    %cst_93 = arith.constant 0.000000e+00 : f32
    %218 = vector.broadcast %cst_93 : f32 to vector<16x64xf32>
    %219 = arith.maximumf %217, %218 : vector<16x64xf32>
    %220 = arith.truncf %219 : vector<16x64xf32> to vector<16x64xbf16>
    %c3_94 = arith.constant 3 : index
    %c0_95 = arith.constant 0 : index
    %c0_96 = arith.constant 0 : index
    %221 = vector.load %arg15[%c3_94, %c0_95, %c0_96] : memref<4x64x32xbf16, #tpu.memory_space<vmem>>, vector<1x64x32xbf16>
    %222 = vector.shape_cast %221 : vector<1x64x32xbf16> to vector<64x32xbf16>
    %cst_97 = arith.constant dense<0.000000e+00> : vector<16x32xf32>
    %223 = tpu.matmul %220, %222, %cst_97 {dimension_numbers = #tpu.dot_dimension_numbers<[1], [0], [0], [1], [0, 0, 1, 1], [], []>} : vector<16x64xbf16>, vector<64x32xbf16>, vector<16x32xf32> -> vector<16x32xf32>
    %c3_98 = arith.constant 3 : index
    %c0_99 = arith.constant 0 : index
    %224 = vector.load %arg16[%c3_98, %c0_99] : memref<4x32xf32, #tpu.memory_space<vmem>>, vector<1x32xf32>
    %225 = vector.broadcast %224 : vector<1x32xf32> to vector<16x32xf32>
    %226 = arith.addf %223, %225 : vector<16x32xf32>
    %c3_i32 = arith.constant 3 : i32
    %227 = vector.broadcast %c3_i32 : i32 to vector<16x1xi32>
    %228 = arith.cmpi eq, %144, %227 : vector<16x1xi32>
    %cst_100 = arith.constant 0.000000e+00 : f32
    %229 = vector.shape_cast %228 : vector<16x1xi1> to vector<16x1xi1>
    %230 = vector.broadcast %229 : vector<16x1xi1> to vector<16x32xi1>
    %231 = vector.broadcast %cst_100 : f32 to vector<16x32xf32>
    %232 = arith.select %230, %226, %231 : vector<16x32xi1>, vector<16x32xf32>
    %233 = arith.addf %211, %232 : vector<16x32xf32>
    %234 = vector.broadcast %137 : vector<16x1xf32> to vector<16x32xf32>
    %235 = arith.mulf %233, %234 : vector<16x32xf32>
    %236 = arith.addf %96, %235 : vector<16x32xf32>
    %c0_101 = arith.constant 0 : index
    %c0_102 = arith.constant 0 : index
    %237 = vector.load %arg17[%c0_101, %c0_102] : memref<16x32xf32, #tpu.memory_space<vmem>>, vector<16x32xf32>
    tpu.vector_store %arg17[%c0_101, %c0_102], %236 {strides = array<i32>} : memref<16x32xf32, #tpu.memory_space<vmem>>, vector<16x32xf32>,
    %c0_103 = arith.constant 0 : index
    %c0_104 = arith.constant 0 : index
    %238 = vector.load %arg18[%c0_103, %c0_104] : memref<16x4xf32, #tpu.memory_space<vmem>>, vector<16x4xf32>
    tpu.vector_store %arg18[%c0_103, %c0_104], %135 {strides = array<i32>} : memref<16x4xf32, #tpu.memory_space<vmem>>, vector<16x4xf32>,
    return
  }
  func.func @transform_0(%arg0: i32) -> (i32, i32) {
    %c0_i32 = arith.constant 0 : i32
    %c0_i32_0 = arith.constant 0 : i32
    return %arg0, %c0_i32 : i32, i32
  }
  func.func @transform_1(%arg0: i32) -> (i32, i32) {
    %c0_i32 = arith.constant 0 : i32
    %c0_i32_0 = arith.constant 0 : i32
    %c0_i32_1 = arith.constant 0 : i32
    return %c0_i32, %c0_i32_0 : i32, i32
  }
  func.func @transform_2(%arg0: i32) -> (i32, i32) {
    %c0_i32 = arith.constant 0 : i32
    %c0_i32_0 = arith.constant 0 : i32
    %c0_i32_1 = arith.constant 0 : i32
    return %c0_i32, %c0_i32_0 : i32, i32
  }
  func.func @transform_3(%arg0: i32) -> (i32, i32) {
    %c0_i32 = arith.constant 0 : i32
    %c0_i32_0 = arith.constant 0 : i32
    %c0_i32_1 = arith.constant 0 : i32
    return %c0_i32, %c0_i32_0 : i32, i32
  }
  func.func @transform_4(%arg0: i32) -> (i32, i32) {
    %c0_i32 = arith.constant 0 : i32
    %c0_i32_0 = arith.constant 0 : i32
    %c0_i32_1 = arith.constant 0 : i32
    return %c0_i32, %c0_i32_0 : i32, i32
  }
  func.func @transform_5(%arg0: i32) -> (i32, i32) {
    %c0_i32 = arith.constant 0 : i32
    %c0_i32_0 = arith.constant 0 : i32
    %c0_i32_1 = arith.constant 0 : i32
    return %c0_i32, %c0_i32_0 : i32, i32
  }
  func.func @transform_6(%arg0: i32) -> (i32, i32) {
    %c0_i32 = arith.constant 0 : i32
    %c0_i32_0 = arith.constant 0 : i32
    %c0_i32_1 = arith.constant 0 : i32
    return %c0_i32, %c0_i32_0 : i32, i32
  }
  func.func @transform_7(%arg0: i32) -> (i32, i32) {
    %c0_i32 = arith.constant 0 : i32
    %c0_i32_0 = arith.constant 0 : i32
    %c0_i32_1 = arith.constant 0 : i32
    return %c0_i32, %c0_i32_0 : i32, i32
  }
  func.func @transform_8(%arg0: i32) -> (i32, i32) {
    %c0_i32 = arith.constant 0 : i32
    %c0_i32_0 = arith.constant 0 : i32
    %c0_i32_1 = arith.constant 0 : i32
    return %c0_i32, %c0_i32_0 : i32, i32
  }
  func.func @transform_9(%arg0: i32) -> (i32, i32) {
    %c0_i32 = arith.constant 0 : i32
    %c0_i32_0 = arith.constant 0 : i32
    %c0_i32_1 = arith.constant 0 : i32
    return %c0_i32, %c0_i32_0 : i32, i32
  }
  func.func @transform_10(%arg0: i32) -> (i32, i32) {
    %c0_i32 = arith.constant 0 : i32
    %c0_i32_0 = arith.constant 0 : i32
    %c0_i32_1 = arith.constant 0 : i32
    return %c0_i32, %c0_i32_0 : i32, i32
  }
  func.func @transform_11(%arg0: i32) -> (i32, i32) {
    %c0_i32 = arith.constant 0 : i32
    %c0_i32_0 = arith.constant 0 : i32
    %c0_i32_1 = arith.constant 0 : i32
    return %c0_i32, %c0_i32_0 : i32, i32
  }
  func.func @transform_12(%arg0: i32) -> (i32, i32, i32) {
    %c0_i32 = arith.constant 0 : i32
    %c0_i32_0 = arith.constant 0 : i32
    %c0_i32_1 = arith.constant 0 : i32
    %c0_i32_2 = arith.constant 0 : i32
    return %c0_i32, %c0_i32_0, %c0_i32_1 : i32, i32, i32
  }
  func.func @transform_13(%arg0: i32) -> (i32, i32) {
    %c0_i32 = arith.constant 0 : i32
    %c0_i32_0 = arith.constant 0 : i32
    %c0_i32_1 = arith.constant 0 : i32
    return %c0_i32, %c0_i32_0 : i32, i32
  }
  func.func @transform_14(%arg0: i32) -> (i32, i32, i32) {
    %c0_i32 = arith.constant 0 : i32
    %c0_i32_0 = arith.constant 0 : i32
    %c0_i32_1 = arith.constant 0 : i32
    %c0_i32_2 = arith.constant 0 : i32
    return %c0_i32, %c0_i32_0, %c0_i32_1 : i32, i32, i32
  }
  func.func @transform_15(%arg0: i32) -> (i32, i32) {
    %c0_i32 = arith.constant 0 : i32
    %c0_i32_0 = arith.constant 0 : i32
    %c0_i32_1 = arith.constant 0 : i32
    return %c0_i32, %c0_i32_0 : i32, i32
  }
  func.func @transform_16(%arg0: i32) -> (i32, i32) {
    %c0_i32 = arith.constant 0 : i32
    %c0_i32_0 = arith.constant 0 : i32
    return %arg0, %c0_i32 : i32, i32
  }
  func.func @transform_17(%arg0: i32) -> (i32, i32) {
    %c0_i32 = arith.constant 0 : i32
    %c0_i32_0 = arith.constant 0 : i32
    return %arg0, %c0_i32 : i32, i32
  }
}

</mosaic_0001>

<bundles_post_ra>
// kernel: tpu_custom_call.1
= control target key start
LH: loop header
LB: loop body
LE: loop exit
PB: predicated region body
PF: predicated region fallthrough
CT: control target
= control target key end

     0   :  { %s4227_s0 = inlined_call_operand.vmem [shape: f32[16,32], index: 0, kind: input, shape index: {}]   ;;  %s4228_s1 = inlined_call_operand.vmem [shape: f32[8,8], index: 1, kind: input, shape index: {}]   ;;  %s4229_s2 = inlined_call_operand.vmem [shape: f32[1,32], index: 2, kind: input, shape index: {}]   ;;  %s4230_s3 = inlined_call_operand.vmem [shape: f32[1,32], index: 3, kind: input, shape index: {}]   ;;  %s4231_s4 = inlined_call_operand.vmem [shape: bf16[32,96], index: 4, kind: input, shape index: {}]   ;;  %s4232_s5 = inlined_call_operand.vmem [shape: f32[1,96], index: 5, kind: input, shape index: {}]   ;;  %s4233_s6 = inlined_call_operand.vmem [shape: bf16[32,32], index: 6, kind: input, shape index: {}]   ;;  %s4234_s7 = inlined_call_operand.vmem [shape: f32[1,32], index: 7, kind: input, shape index: {}]   ;;  %s4235_s8 = inlined_call_operand.vmem [shape: f32[1,32], index: 8, kind: input, shape index: {}]   ;;  %s4236_s9 = inlined_call_operand.vmem [shape: f32[1,32], index: 9, kind: input, shape index: {}]   ;;  %s4237_s10 = inlined_call_operand.vmem [shape: bf16[32,4], index: 10, kind: input, shape index: {}]   ;;  %s4238_s11 = inlined_call_operand.vmem [shape: f32[1,4], index: 11, kind: input, shape index: {}]   ;;  %s4239_s12 = inlined_call_operand.vmem [shape: bf16[4,32,64], index: 12, kind: input, shape index: {}]   ;;  %s4240_s13 = inlined_call_operand.vmem [shape: f32[4,64], index: 13, kind: input, shape index: {}]   ;;  %s4241_s14 = inlined_call_operand.vmem [shape: bf16[4,64,32], index: 14, kind: input, shape index: {}]   ;;  %s4242_s15 = inlined_call_operand.vmem [shape: f32[4,32], index: 15, kind: input, shape index: {}]   ;;  %s4243_s16 = inlined_call_operand.hbm [shape: f32[16,32], index: 16, kind: output, shape index: {0}]   ;;  %s4244_s17 = inlined_call_operand.vmem [shape: f32[16,4], index: 17, kind: output, shape index: {1}]  }
   0x1   :  { %4246 = sst [smem:[#allocation5_spill]] %s4227_s0 }
   0x2   :  { %4247 = sst [smem:[#allocation6_spill]] %s4228_s1 }
   0x3   :  { %s4248_s26 = sld [smem:[#allocation5_spill]]  ;;  %vm61_vm0 = vcmask 261120  }
   0x9   :  { %v57_v0 = vld [vmem:[%s4248_s26] sm:$0xff]  ;;  %v58_v2 = vld [vmem:[%s4248_s26 + $0x8] sm:$0xff] }
   0xa   :  { %v62_v1 = vsel %vm61_vm0, %v57_v0, 0.0 }
   0xb   :  { %63 = vadd.xlane.f32.xlu0 %v62_v1 }
   0xc   :  { %23 = vsyncpa [#allocation3], 0  ;;  %v65_v3 = vsel %vm61_vm0, %v58_v2, 0.0  ;;  %v3339_v4 = vmov 32.0   ;;  %v3100_v21 = vld [vmem:[%s4231_s4 + $0x8] sm:$0xff]  ;;  %v3099_v23 = vld [vmem:[%s4231_s4] sm:$0xff] }
   0xd   :  { %3261 = vrcp.f32 %v3339_v4  ;;  %153 = vmatpush.bf16.msra.mxu0 %v3100_v21  ;;  %v3246_v42 = vld [vmem:[%s4229_s2] ss:$0 sm:$0xff]  ;;  %s3340_s2 = smov 112   ;;  %s3341_s23 = smov 120   ;;  %vm173_vm8 = vcmask 1047556   ;;  %vm842_vm9 = vcmask 1043456  }
   0xe   :  { %v3247_v47 = vld [vmem:[%s4230_s3] ss:$0 sm:$0xff]  ;;  %s3342_s3 = smov 104   ;;  %s3346_s24 = smov 64   ;;  %vm838_vm10 = vcmask 64512   ;;  %vm1215_vm11 = vcmask 130048  }
   0xf   :  { %v3248_v52 = vld [vmem:[%s4232_s5] ss:$0 sm:$0xff]  ;;  %s3343_s5 = smov 96   ;;  %s4249_s28 = sld [smem:[#allocation6_spill]]  ;;  %vm1217_vm12 = vcmask 195584  }
  0x10   :  { %s3347_s29 = smov 24   ;;  %s3348_s0 = smov 16  }
  0x11   :  { %154 = vmatpush.bf16.msra.mxu0 %v3099_v23  ;;  %s3349_s30 = smov 8   ;;  %s3351_s27 = smov 128  }
  0x13   :  { %66 = vadd.xlane.f32.xlu0 %v65_v3  ;;  %v3262_v5 = vpop.eup %3261  ;;  %v3345_v3 = vmov 1934713408  }
  0x14   :  { %v69_v6 = vmul.f32 32.0, %v3262_v5  ;;  %vm73_vm1 = vweird.f32 %v3262_v5  ;;  %v202_v4 = vunpack.c.l.s4 %v3345_v3 }
  0x16   :  { %v70_v7 = vsub.f32 1.0, %v69_v6 }
  0x18   :  { %v71_v8 = vmul.f32 %v3262_v5, %v70_v7 }
  0x1a   :  { %v72_v9 = vadd.f32 %v3262_v5, %v71_v8 }
  0x1c   :  { %v3450_v10 = vsel %vm73_vm1, %v3262_v5, %v72_v9  ;;  %v3504_v9 = vunpack.c.0.s8 %v202_v4 }
  0x7e   :  { %v64_v11 = vpop.xlane.xlu0 %63 }
  0x7f   :  { %v75_v12 = vmul.f32 %v3450_v10, %v64_v11 }
  0x81   :  { %v77_v13 = vsub.f32 %v57_v0, %v75_v12  ;;  %v3344_v0 = vmov 1983009808  }
  0x82   :  { %v178_v1 = vunpack.c.l.s4 %v3344_v0 }
  0x83   :  { %v79_v14 = vmul.f32 %v77_v13, %v77_v13 }
  0x85   :  { %v81_v15 = vsel %vm61_vm0, %v79_v14, 0.0 }
  0x86   :  { %82 = vadd.xlane.f32.xlu1 %v81_v15  ;;  %v67_v16 = vpop.xlane.xlu0 %66 }
  0x87   :  { %v76_v17 = vmul.f32 %v3450_v10, %v67_v16 }
  0x89   :  { %v78_v18 = vsub.f32 %v58_v2, %v76_v17  ;;  %v3497_v2 = vunpack.c.0.s8 %v178_v1 }
  0x8b   :  { %v80_v19 = vmul.f32 %v78_v18, %v78_v18 }
  0x8d   :  { %v84_v20 = vsel %vm61_vm0, %v80_v19, 0.0 }
  0x8e   :  { %85 = vadd.xlane.f32.xlu1 %v84_v20 }
  0xf9   :  { %v83_v22 = vpop.xlane.xlu1 %82 }
  0xfa   :  { %v87_v24 = vmul.f32 %v83_v22, %v3450_v10 }
  0xfc   :  { %v89_v25 = vadd.f32 1e-05, %v87_v24 }
  0xfe   :  { %3263 = vrsqrt.f32 %v89_v25  ;;  %vm97_vm3 = vweird.f32 %v89_v25 }
 0x101   :  { %v86_v26 = vpop.xlane.xlu1 %85 }
 0x102   :  { %v88_v27 = vmul.f32 %v86_v26, %v3450_v10 }
 0x104   :  { %v3264_v28 = vpop.eup %3263  ;;  %v90_v29 = vadd.f32 1e-05, %v88_v27 }
 0x105   :  { %v92_v30 = vmul.f32 %v3264_v28, %v89_v25  ;;  %vm98_vm2 = vweird.f32 %v3264_v28 }
 0x106   :  { %3265 = vrsqrt.f32 %v90_v29  ;;  %vm99_vm4 = vmor %vm97_vm3, %vm98_vm2  ;;  %vm107_vm6 = vweird.f32 %v90_v29 }
 0x107   :  { %v93_v31 = vmul.f32 %v3264_v28, %v92_v30 }
 0x109   :  { %v94_v32 = vmul.f32 0.5, %v93_v31 }
 0x10b   :  { %v95_v33 = vsub.f32 1.5, %v94_v32 }
 0x10c   :  { %v3266_v34 = vpop.eup %3265 }
 0x10d   :  { %v96_v35 = vmul.f32 %v3264_v28, %v95_v33  ;;  %v102_v36 = vmul.f32 %v3266_v34, %v90_v29  ;;  %vm108_vm5 = vweird.f32 %v3266_v34 }
 0x10e   :  { %vm109_vm7 = vmor %vm107_vm6, %vm108_vm5  ;;  %vm2564_vm5 = vcmask 523264  }
 0x10f   :  { %v103_v37 = vmul.f32 %v3266_v34, %v102_v36  ;;  %v100_v38 = vsel %vm99_vm4, %v3264_v28, %v96_v35  ;;  %vm2404_vm4 = vcmask 31744  }
 0x110   :  { %v111_v41 = vmul.f32 %v100_v38, %v77_v13 }
 0x111   :  { %v104_v39 = vmul.f32 0.5, %v103_v37 }
 0x112   :  { %v116_v46 = vmul.f32 %v3246_v42, %v111_v41 }
 0x113   :  { %v105_v40 = vsub.f32 1.5, %v104_v39 }
 0x114   :  { %v121_v49 = vadd.f32 %v3247_v47, %v116_v46 }
 0x115   :  { %v106_v43 = vmul.f32 %v3266_v34, %v105_v40 }
 0x117   :  { %v110_v44 = vsel %vm109_vm7, %v3266_v34, %v106_v43 }
 0x118   :  { %v112_v45 = vmul.f32 %v110_v44, %v78_v18 }
 0x11a   :  { %v117_v48 = vmul.f32 %v3246_v42, %v112_v45 }
 0x11c   :  { %v122_v50 = vadd.f32 %v3247_v47, %v117_v48 }
 0x11e   :  { %v123_v51 = vpack.c.bf16 %v122_v50, %v121_v49 }
 0x120   :  { %2924 = vmatmul.msk.bf16.vlgmr.msra.gmra.mxu0 %vm61_vm0, %v123_v51 }
 0x19d   :  { %v156_v53 = vpop.f32.mrf.mxu0 }
 0x19e   :  { %v3474_v54 = vadd.f32 %v3248_v52, %v156_v53 }
 0x1a0   :  { %166 = vrot.lane.b32.xlu0 %v3474_v54, %s3340_s2  ;;  %163 = vrot.lane.b32.xlu2 %v3474_v54, %s3341_s23  ;;  %v175_v6 = vrot.slane %v3474_v54, 4 }
 0x1a5   :  { %v158_v55 = vpop.f32.mrf.mxu0 }
 0x1a6   :  { %v3481_v56 = vadd.f32 %v3248_v52, %v158_v55 }
 0x1a8   :  { %169 = vrot.lane.b32.xlu2 %v3474_v54, %s3342_s3 }
 0x1b0   :  { %1220 = vrot.lane.b32.xlu2 %v3481_v56, %s3341_s23 }
 0x1fa   :  { %v3484_v57 = vpop.permute.xlu2 %163 }
 0x1fb   :  { %v3143_v58 = vpack.i.bf16 %v3474_v54, %v3484_v57  ;;  %v187_v59 = vrot.slane %v3484_v57, 4 }
 0x1fd   :  { %3144 = vrot.lane.b32.xlu1 %v3143_v58, %s3343_s5 }
 0x202   :  { %v3490_v60 = vpop.permute.xlu2 %169 }
 0x203   :  { %v185_v61 = vrot.slane %v3490_v60, 4  ;;  %v188_v62 = vsel %vm173_vm8, %v3490_v60, %v187_v59 }
 0x204   :  { %v196_v5 = vperm.slane %v188_v62, %v3497_v2 }
 0x205   :  { %v186_v63 = vsel %vm173_vm8, %v185_v61, %v3484_v57 }
 0x206   :  { %v192_v7 = vperm.slane %v186_v63, %v3497_v2  ;;  %v209_v14 = vrot.slane %v196_v5, 4 }
 0x208   :  { %v197_v17 = vrot.slane %v192_v7, 4 }
 0x212   :  { %v3502_v8 = vpop.permute.xlu0 %166 }
 0x213   :  { %v172_v11 = vrot.slane %v3502_v8, 4  ;;  %v176_v12 = vsel %vm173_vm8, %v3502_v8, %v175_v6  ;;  %v3148_v13 = vpack.i.bf16 %v3502_v8, %v3490_v60 }
 0x214   :  { %v184_v15 = vperm.slane %v176_v12, %v3497_v2 }
 0x215   :  { %v174_v16 = vsel %vm173_vm8, %v172_v11, %v3474_v54  ;;  %3149 = vrot.lane.b32.xlu2 %v3148_v13, %s3343_s5 }
 0x216   :  { %v180_v18 = vperm.slane %v174_v16, %v3497_v2  ;;  %v210_v19 = vsel %vm173_vm8, %v209_v14, %v184_v15  ;;  %v211_v20 = vrot.slane %v184_v15, 4 }
 0x217   :  { %v216_v21 = vperm.slane %v210_v19, %v3504_v9  ;;  %v3564_v19 = vpop.permute.xlu2 %1220 }
 0x218   :  { %v198_v22 = vsel %vm173_vm8, %v197_v17, %v180_v18  ;;  %v199_v23 = vrot.slane %v180_v18, 4  ;;  %v212_v24 = vsel %vm173_vm8, %v196_v5, %v211_v20 }
 0x219   :  { %v204_v25 = vperm.slane %v198_v22, %v3504_v9  ;;  %v220_v26 = vperm.slane %v212_v24, %v3504_v9  ;;  %v225_v27 = vrot.slane %v216_v21, 4  ;;  %v233_v28 = vpack.c.bf16 %v216_v21, %v216_v21 }
 0x21a   :  { %v200_v29 = vsel %vm173_vm8, %v192_v7, %v199_v23 }
 0x21b   :  { %v208_v30 = vperm.slane %v200_v29, %v3504_v9  ;;  %v221_v31 = vrot.slane %v204_v25, 4  ;;  %v226_v32 = vsel %vm173_vm8, 0.0, %v225_v27  ;;  %v227_v33 = vrot.slane %v220_v26, 4 }
 0x21c   :  { %v229_v34 = vpack.c.bf16 %v204_v25, %v204_v25  ;;  %v234_v35 = vpack.c.bf16 %v226_v32, %v226_v32  ;;  %v235_v36 = vpack.c.bf16 %v220_v26, %v220_v26  ;;  %v389_v37 = vrot.slane %v233_v28, 4 }
 0x21d   :  { %v223_v38 = vrot.slane %v208_v30, 4  ;;  %v228_v39 = vsel %vm173_vm8, 0.0, %v227_v33  ;;  %v222_v40 = vsel %vm173_vm8, 0.0, %v221_v31  ;;  %v231_v41 = vpack.c.bf16 %v208_v30, %v208_v30 }
 0x21e   :  { %v236_v42 = vpack.c.bf16 %v228_v39, %v228_v39  ;;  %v396_v43 = vrot.slane %v235_v36, 4  ;;  %v410_v44 = vrot.slane %v234_v35, 4  ;;  %v230_v45 = vpack.c.bf16 %v222_v40, %v222_v40 }
 0x21f   :  { %v224_v46 = vsel %vm173_vm8, 0.0, %v223_v38  ;;  %v391_v47 = vsel %vm173_vm8, %v389_v37, %v229_v34 }
 0x220   :  { %v416_v48 = vrot.slane %v236_v42, 4  ;;  %v232_v49 = vpack.c.bf16 %v224_v46, %v224_v46  ;;  %v397_v50 = vsel %vm173_vm8, %v396_v43, %v231_v41  ;;  %v411_v52 = vsel %vm173_vm8, %v410_v44, %v230_v45 }
 0x221   :  { %v401_v51 = vperm.slane %v397_v50, %v3497_v2  ;;  %v395_v55 = vperm.slane %v391_v47, %v3497_v2  ;;  %v415_v62 = vperm.slane %v411_v52, %v3497_v2 }
 0x222   :  { %v417_v53 = vsel %vm173_vm8, %v416_v48, %v232_v49 }
 0x223   :  { %v402_v58 = vrot.slane %v401_v51, 4  ;;  %v421_v59 = vperm.slane %v417_v53, %v3497_v2 }
 0x225   :  { %v403_v61 = vsel %vm173_vm8, %v402_v58, %v395_v55  ;;  %v422_v63 = vrot.slane %v421_v59, 4 }
 0x226   :  { %v3538_v0 = vperm.slane %v403_v61, %v3504_v9 }
 0x227   :  { %v423_v1 = vsel %vm173_vm8, %v422_v63, %v415_v62 }
 0x228   :  { %v3542_v3 = vperm.slane %v423_v1, %v3504_v9  ;;  %v408_v4 = vrot.slane %v3538_v0, 4  ;;  %v433_v5 = vshrl.u32 %v3538_v0, 16 }
 0x22a   :  { %v432_v6 = vpack.i.b16 %v3542_v3, %v3538_v0  ;;  %v434_v7 = vshrl.u32 %v3542_v3, 16  ;;  %v3550_v11 = vsel %vm173_vm8, 0, %v408_v4  ;;  %v428_v12 = vrot.slane %v3542_v3, 4 }
 0x22b   :  { %v439_v16 = vshrl.u32 %v3550_v11, 16 }
 0x22c   :  { %v3553_v13 = vpack.i.b16 %v434_v7, %v433_v5  ;;  %v3556_v14 = vsel %vm173_vm8, 0, %v428_v12 }
 0x22d   :  { %v438_v15 = vpack.i.b16 %v3556_v14, %v3550_v11  ;;  %v440_v17 = vshrl.u32 %v3556_v14, 16 }
 0x22f   :  { %v3562_v18 = vpack.i.b16 %v440_v17, %v439_v16 }
 0x26f   :  { %v3145_v20 = vpop.permute.xlu1 %3144  ;;  %v3150_v21 = vpop.permute.xlu2 %3149 }
 0x270   :  { %v3147_v22 = vunpack.i.h.bf16 %v3145_v20  ;;  %v3146_v23 = vunpack.i.l.bf16 %v3145_v20  ;;  %v3152_v24 = vunpack.i.h.bf16 %v3150_v21  ;;  %v3151_v25 = vunpack.i.l.bf16 %v3150_v21 }
 0x272   :  { %v251_v26 = vrot.slane %v3147_v22, 4  ;;  %v263_v27 = vrot.slane %v3146_v23, 4  ;;  %v249_v28 = vrot.slane %v3152_v24, 4  ;;  %v261_v29 = vrot.slane %v3151_v25, 4 }
 0x274   :  { %v250_v30 = vsel %vm173_vm8, %v249_v28, %v3147_v22  ;;  %v252_v31 = vsel %vm173_vm8, %v3152_v24, %v251_v26  ;;  %v262_v32 = vsel %vm173_vm8, %v261_v29, %v3146_v23  ;;  %v264_v33 = vsel %vm173_vm8, %v3151_v25, %v263_v27 }
 0x275   :  { %v260_v34 = vperm.slane %v252_v31, %v3497_v2  ;;  %v268_v35 = vperm.slane %v262_v32, %v3497_v2  ;;  %v272_v36 = vperm.slane %v264_v33, %v3497_v2  ;;  %v256_v37 = vperm.slane %v250_v30, %v3497_v2 }
 0x277   :  { %v287_v38 = vrot.slane %v260_v34, 4  ;;  %v273_v39 = vrot.slane %v268_v35, 4  ;;  %v285_v40 = vrot.slane %v272_v36, 4  ;;  %v275_v50 = vrot.slane %v256_v37, 4 }
 0x279   :  { %v288_v41 = vsel %vm173_vm8, %v272_v36, %v287_v38  ;;  %v286_v42 = vsel %vm173_vm8, %v285_v40, %v260_v34  ;;  %v274_v43 = vsel %vm173_vm8, %v273_v39, %v256_v37  ;;  %v276_v1 = vsel %vm173_vm8, %v268_v35, %v275_v50 }
 0x27a   :  { %v296_v44 = vperm.slane %v288_v41, %v3504_v9  ;;  %v292_v45 = vperm.slane %v286_v42, %v3504_v9  ;;  %v280_v46 = vperm.slane %v274_v43, %v3504_v9  ;;  %v284_v4 = vperm.slane %v276_v1, %v3504_v9 }
 0x27c   :  { %v303_v47 = vrot.slane %v296_v44, 4  ;;  %v301_v48 = vrot.slane %v292_v45, 4  ;;  %v297_v49 = vrot.slane %v280_v46, 4  ;;  %v311_v53 = vpack.c.bf16 %v296_v44, %v296_v44 }
 0x27d   :  { %v309_v61 = vpack.c.bf16 %v292_v45, %v292_v45  ;;  %v305_v63 = vpack.c.bf16 %v280_v46, %v280_v46  ;;  %v299_v5 = vrot.slane %v284_v4, 4  ;;  %v307_v12 = vpack.c.bf16 %v284_v4, %v284_v4 }
 0x27e   :  { %v304_v51 = vsel %vm173_vm8, 0.0, %v303_v47  ;;  %v302_v52 = vsel %vm173_vm8, 0.0, %v301_v48  ;;  %v298_v59 = vsel %vm173_vm8, 0.0, %v297_v49 }
 0x27f   :  { %v312_v55 = vpack.c.bf16 %v304_v51, %v304_v51  ;;  %v310_v58 = vpack.c.bf16 %v302_v52, %v302_v52  ;;  %v306_v62 = vpack.c.bf16 %v298_v59, %v298_v59  ;;  %v300_v7 = vsel %vm173_vm8, 0.0, %v299_v5 }
 0x280   :  { %v308_v16 = vpack.c.bf16 %v300_v7, %v300_v7 }
 0x281   :  { %3153 = vxpose.binary.xlu1.c.b16.start.end [1/2] (short) (narrow) %v312_v55, %v311_v53, 16 }
 0x282   :  { %3156 = vxpose.binary.xlu2.c.b16.start.end [1/2] (short) (narrow) %v310_v58, %v309_v61, 16 }
 0x283   :  { %3159 = vxpose.binary.xlu0.c.b16.start.end [1/2] (short) (narrow) %v306_v62, %v305_v63, 16 }
 0x292   :  { %3162 = vxpose.binary.xlu2.c.b16.start.end [1/2] (short) (narrow) %v308_v16, %v307_v12, 16 }
 0x323   :  { %v3157_v17 = vpop.trf.xlu2 }
 0x324   :  { %v570_v23 = vrot.slane %v3157_v17, 4 }
 0x32b   :  { %v3158_v20 = vpop.trf.xlu2 }
 0x32c   :  { %v598_v31 = vrot.slane %v3158_v20, 4 }
 0x32d   :  { %v3154_v21 = vpop.trf.xlu1 }
 0x32e   :  { %v576_v24 = vrot.slane %v3154_v21, 4 }
 0x32f   :  { %v3160_v22 = vpop.trf.xlu0 }
 0x330   :  { %v571_v25 = vsel %vm173_vm8, %v570_v23, %v3160_v22 }
 0x331   :  { %v575_v28 = vperm.slane %v571_v25, %v3497_v2 }
 0x333   :  { %v3163_v26 = vpop.trf.xlu2  ;;  %v584_v36 = vrot.slane %v575_v28, 4 }
 0x334   :  { %v577_v27 = vsel %vm173_vm8, %v576_v24, %v3163_v26 }
 0x335   :  { %v581_v29 = vperm.slane %v577_v27, %v3497_v2  ;;  %v3155_v30 = vpop.trf.xlu1 }
 0x336   :  { %v604_v35 = vrot.slane %v3155_v30, 4 }
 0x337   :  { %v582_v32 = vrot.slane %v581_v29, 4  ;;  %v3161_v33 = vpop.trf.xlu0  ;;  %v585_v39 = vsel %vm173_vm8, %v581_v29, %v584_v36  ;;  %v3187_v29 = vpack.i.bf16 %v3484_v57, %v3474_v54 }
 0x338   :  { %v599_v34 = vsel %vm173_vm8, %v598_v31, %v3161_v33  ;;  %v593_v45 = vperm.slane %v585_v39, %v3504_v9 }
 0x339   :  { %v583_v37 = vsel %vm173_vm8, %v582_v32, %v575_v28  ;;  %v603_v38 = vperm.slane %v599_v34, %v3497_v2  ;;  %v3177_v28 = vpack.i.bf16 %v3481_v56, %v3564_v19 }
 0x33a   :  { %v589_v41 = vperm.slane %v583_v37, %v3504_v9  ;;  %v646_v51 = vshrl.u32 %v593_v45, 16  ;;  %v596_v21 = vrot.slane %v593_v45, 4 }
 0x33b   :  { %v3164_v40 = vpop.trf.xlu2  ;;  %v612_v43 = vrot.slane %v603_v38, 4 }
 0x33c   :  { %v605_v42 = vsel %vm173_vm8, %v604_v35, %v3164_v40  ;;  %v594_v48 = vrot.slane %v589_v41, 4  ;;  %v630_v55 = vshrl.u32 %v589_v41, 16  ;;  %v597_v23 = vsel %vm173_vm8, 0, %v596_v21 }
 0x33d   :  { %v609_v44 = vperm.slane %v605_v42, %v3497_v2  ;;  %v654_v25 = vshrl.u32 %v597_v23, 16 }
 0x33e   :  { %v595_v58 = vsel %vm173_vm8, 0, %v594_v48 }
 0x33f   :  { %v610_v46 = vrot.slane %v609_v44, 4  ;;  %v613_v47 = vsel %vm173_vm8, %v609_v44, %v612_v43  ;;  %v638_v7 = vshrl.u32 %v595_v58, 16 }
 0x340   :  { %v621_v49 = vperm.slane %v613_v47, %v3504_v9 }
 0x341   :  { %v611_v50 = vsel %vm173_vm8, %v610_v46, %v603_v38 }
 0x342   :  { %v647_v52 = vshrl.u32 %v621_v49, 16  ;;  %v617_v53 = vperm.slane %v611_v50, %v3504_v9  ;;  %v644_v59 = vpack.i.b16 %v621_v49, %v593_v45  ;;  %v624_v20 = vrot.slane %v621_v49, 4 }
 0x344   :  { %v648_v61 = vpack.i.b16 %v647_v52, %v646_v51  ;;  %v631_v62 = vshrl.u32 %v617_v53, 16  ;;  %v622_v63 = vrot.slane %v617_v53, 4  ;;  %v628_v1 = vpack.i.b16 %v617_v53, %v589_v41 }
 0x345   :  { %v625_v22 = vsel %vm173_vm8, 0, %v624_v20 }
 0x346   :  { %3168 = vxpose.binary.xlu0.c.b16.start.end [1/2] (short) (narrow) %v648_v61, %v644_v59, 16  ;;  %v632_v4 = vpack.i.b16 %v631_v62, %v630_v55  ;;  %v623_v5 = vsel %vm173_vm8, 0, %v622_v63  ;;  %v655_v24 = vshrl.u32 %v625_v22, 16  ;;  %v652_v26 = vpack.i.b16 %v625_v22, %v597_v23 }
 0x347   :  { %v639_v12 = vshrl.u32 %v623_v5, 16  ;;  %v636_v16 = vpack.i.b16 %v623_v5, %v595_v58 }
 0x348   :  { %3165 = vxpose.binary.xlu1.c.b16.start.end [1/2] (short) (narrow) %v632_v4, %v628_v1, 16  ;;  %v656_v27 = vpack.i.b16 %v655_v24, %v654_v25 }
 0x349   :  { %v640_v17 = vpack.i.b16 %v639_v12, %v638_v7 }
 0x34b   :  { %3171 = vxpose.binary.xlu2.c.b16.start.end [1/2] (short) (narrow) %v640_v17, %v636_v16, 16 }
 0x356   :  { %3174 = vxpose.binary.xlu0.c.b16.start.end [1/2] (short) (narrow) %v656_v27, %v652_v26, 16 }
 0x3a2   :  { %1223 = vrot.lane.b32.xlu1 %v3481_v56, %s3340_s2 }
 0x3b4   :  { %3178 = vrot.lane.b32.xlu2 %v3177_v28, %s3343_s5 }
 0x3bc   :  { %3188 = vrot.lane.b32.xlu2 %v3187_v29, %s3346_s24 }
 0x3c4   :  { %1226 = vrot.lane.b32.xlu0 %v3481_v56, %s3342_s3 }
 0x3ec   :  { %v3172_v34 = vpop.trf.xlu2 }
 0x3f2   :  { %v3169_v30 = vpop.trf.xlu0 }
 0x3f3   :  { %v786_v32 = vrot.slane %v3169_v30, 4 }
 0x3f4   :  { %v3166_v33 = vpop.trf.xlu1  ;;  %v3173_v46 = vpop.trf.xlu2 }
 0x3f5   :  { %v787_v37 = vsel %vm173_vm8, %v786_v32, %v3166_v33 }
 0x3f6   :  { %v791_v57 = vperm.slane %v787_v37, %v3497_v2 }
 0x3fa   :  { %v3170_v31 = vpop.trf.xlu0 }
 0x3fb   :  { %v806_v54 = vrot.slane %v3170_v31, 4 }
 0x3fc   :  { %v3167_v42 = vpop.trf.xlu1 }
 0x3fd   :  { %v807_v44 = vsel %vm173_vm8, %v806_v54, %v3167_v42 }
 0x3fe   :  { %v811_v49 = vperm.slane %v807_v44, %v3497_v2 }
 0x402   :  { %v3175_v35 = vpop.trf.xlu0 }
 0x403   :  { %v792_v36 = vrot.slane %v3175_v35, 4 }
 0x405   :  { %v793_v38 = vsel %vm173_vm8, %v792_v36, %v3172_v34 }
 0x406   :  { %v797_v39 = vperm.slane %v793_v38, %v3497_v2 }
 0x408   :  { %v798_v40 = vrot.slane %v797_v39, 4 }
 0x40a   :  { %v3176_v41 = vpop.trf.xlu0  ;;  %v799_v45 = vsel %vm173_vm8, %v798_v40, %v791_v57 }
 0x40b   :  { %v812_v43 = vrot.slane %v3176_v41, 4  ;;  %v803_v50 = vperm.slane %v799_v45, %v3504_v9 }
 0x40d   :  { %v813_v47 = vsel %vm173_vm8, %v812_v43, %v3173_v46  ;;  %v804_v53 = vrot.slane %v803_v50, 4  ;;  %v829_v58 = vshrl.u32 %v803_v50, 16 }
 0x40e   :  { %v817_v48 = vperm.slane %v813_v47, %v3497_v2  ;;  %v3179_v11 = vpop.permute.xlu2 %3178 }
 0x40f   :  { %v805_v62 = vsel %vm173_vm8, 0, %v804_v53  ;;  %v3181_v14 = vunpack.i.h.bf16 %v3179_v11 }
 0x410   :  { %v818_v51 = vrot.slane %v817_v48, 4  ;;  %v835_v4 = vshrl.u32 %v805_v62, 16 }
 0x411   :  { %v1307_v29 = vrot.slane %v3181_v14, 4 }
 0x412   :  { %v819_v52 = vsel %vm173_vm8, %v818_v51, %v811_v49 }
 0x413   :  { %v823_v55 = vperm.slane %v819_v52, %v3504_v9 }
 0x414   :  { %v3646_v0 = vpop.permute.xlu1 %1223 }
 0x415   :  { %v828_v59 = vpack.i.b16 %v823_v55, %v803_v50  ;;  %v830_v61 = vshrl.u32 %v823_v55, 16  ;;  %v824_v63 = vrot.slane %v823_v55, 4 }
 0x417   :  { %v844_v1 = vsel %vm842_vm9, %v828_v59, 0  ;;  %v831_v5 = vpack.i.b16 %v830_v61, %v829_v58  ;;  %v825_v7 = vsel %vm173_vm8, 0, %v824_v63 }
 0x418   :  { %853 = vmatpush.bf16.msra.mxu1 %v844_v1  ;;  %v834_v12 = vpack.i.b16 %v825_v7, %v805_v62  ;;  %v836_v16 = vshrl.u32 %v825_v7, 16 }
 0x419   :  { %v863_v17 = vsel %vm842_vm9, %v831_v5, 0 }
 0x41a   :  { %872 = vmatpush.bf16.msra.mxu2 %v863_v17  ;;  %v882_v20 = vsel %vm842_vm9, %v834_v12, 0  ;;  %v837_v21 = vpack.i.b16 %v836_v16, %v835_v4 }
 0x41b   :  { %2925 = vmatmul.msk.bf16.vlgmr.msra.gmra.mxu1 %vm838_vm10, %v432_v6  ;;  %891 = vmatpush.bf16.msra.mxu3 %v882_v20 }
 0x41c   :  { %v901_v22 = vsel %vm842_vm9, %v837_v21, 0 }
 0x41d   :  { %2926 = vmatmul.msk.bf16.vlgmr.msra.gmra.mxu2 %vm838_vm10, %v3553_v13  ;;  %910 = vmatpush.bf16.msrb.mxu1 %v901_v22 }
 0x41e   :  { %2927 = vmatmul.msk.bf16.vlgmr.msra.gmra.mxu3 %vm838_vm10, %v438_v15  ;;  %v3180_v15 = vunpack.i.l.bf16 %v3179_v11 }
 0x420   :  { %v1319_v30 = vrot.slane %v3180_v15, 4 }
 0x42b   :  { %2928 = vmatmul.msk.bf16.vlgmr.msrb.gmra.mxu1 %vm838_vm10, %v3562_v18 }
 0x436   :  { %v3648_v3 = vpop.permute.xlu0 %1226 }
 0x437   :  { %v3182_v6 = vpack.i.bf16 %v3646_v0, %v3648_v3 }
 0x439   :  { %3183 = vrot.lane.b32.xlu1 %v3182_v6, %s3343_s5  ;;  %v3201_v6 = vpack.i.bf16 %v3490_v60, %v3502_v8  ;;  %s2900_s5 = sshll.u32 %s4243_s16, 4  ;;  %s2901_s5 = int_to_ptr.hbm [resolvable:$true] %s2900_s5 }
 0x498   :  { %v3653_v23 = vpop.f32.mrf.mxu1 }
 0x4a0   :  { %v857_v13 = vpop.f32.mrf.mxu1  ;;  %v874_v24 = vpop.f32.mrf.mxu2 }
 0x4a1   :  { %v893_v25 = vpop.f32.mrf.mxu3  ;;  %v3681_v13 = vld [vmem:[%s4249_s28] sm:$0xff] }
 0x4a2   :  { %v3684_v11 = vadd.f32 %v874_v24, %v3681_v13  ;;  %v3698_v24 = vpop.permute.xlu2 %3188 }
 0x4a8   :  { %v912_v26 = vpop.f32.mrf.mxu1  ;;  %v876_v27 = vpop.f32.mrf.mxu2 }
 0x4a9   :  { %v895_v18 = vpop.f32.mrf.mxu3  ;;  %v3694_v8 = vadd.f32 %v912_v26, %v3681_v13 }
 0x4ab   :  { %v3184_v28 = vpop.permute.xlu1 %3183  ;;  %v925_v27 = vsel %vm838_vm10, %v3694_v8, -inf }
 0x4ac   :  { %v3186_v31 = vunpack.i.h.bf16 %v3184_v28  ;;  %v3185_v32 = vunpack.i.l.bf16 %v3184_v28 }
 0x4ae   :  { %v1305_v33 = vrot.slane %v3186_v31, 4  ;;  %v1308_v34 = vsel %vm173_vm8, %v3186_v31, %v1307_v29  ;;  %v1317_v35 = vrot.slane %v3185_v32, 4  ;;  %v1320_v36 = vsel %vm173_vm8, %v3185_v32, %v1319_v30 }
 0x4af   :  { %v1316_v37 = vperm.slane %v1308_v34, %v3497_v2  ;;  %v1328_v38 = vperm.slane %v1320_v36, %v3497_v2 }
 0x4b0   :  { %v1306_v39 = vsel %vm173_vm8, %v1305_v33, %v3181_v14  ;;  %v1318_v54 = vsel %vm173_vm8, %v1317_v35, %v3180_v15  ;;  %v914_v57 = vpop.f32.mrf.mxu1  ;;  %v3687_v14 = vadd.f32 %v893_v25, %v3681_v13  ;;  %v919_v15 = vsel %vm838_vm10, %v3684_v11, -inf }
 0x4b1   :  { %v1324_v40 = vperm.slane %v1318_v54, %v3497_v2  ;;  %v1341_v41 = vrot.slane %v1328_v38, 4  ;;  %v1343_v42 = vrot.slane %v1316_v37, 4  ;;  %v1312_v43 = vperm.slane %v1306_v39, %v3497_v2 }
 0x4b2   :  { %v922_v60 = vsel %vm838_vm10, %v3687_v14, -inf }
 0x4b3   :  { %v1329_v44 = vrot.slane %v1324_v40, 4  ;;  %v1344_v45 = vsel %vm173_vm8, %v1328_v38, %v1343_v42  ;;  %v1342_v46 = vsel %vm173_vm8, %v1341_v41, %v1316_v37  ;;  %v1331_v53 = vrot.slane %v1312_v43, 4 }
 0x4b4   :  { %v1352_v47 = vperm.slane %v1344_v45, %v3504_v9  ;;  %v1348_v48 = vperm.slane %v1342_v46, %v3504_v9 }
 0x4b5   :  { %v1330_v49 = vsel %vm173_vm8, %v1329_v44, %v1312_v43  ;;  %v1332_v12 = vsel %vm173_vm8, %v1324_v40, %v1331_v53 }
 0x4b6   :  { %v1359_v50 = vrot.slane %v1352_v47, 4  ;;  %v1357_v51 = vrot.slane %v1348_v48, 4  ;;  %v1336_v52 = vperm.slane %v1330_v49, %v3504_v9  ;;  %v1367_v59 = vpack.c.bf16 %v1352_v47, %v1352_v47 }
 0x4b7   :  { %v1365_v1 = vpack.c.bf16 %v1348_v48, %v1348_v48  ;;  %v1340_v16 = vperm.slane %v1332_v12, %v3504_v9  ;;  %v3191_v48 = vunpack.i.h.bf16 %v3698_v24 }
 0x4b8   :  { %v1360_v55 = vsel %vm173_vm8, 0.0, %v1359_v50  ;;  %v1358_v58 = vsel %vm173_vm8, 0.0, %v1357_v51  ;;  %v1353_v63 = vrot.slane %v1336_v52, 4  ;;  %v1361_v5 = vpack.c.bf16 %v1336_v52, %v1336_v52 }
 0x4b9   :  { %v1368_v61 = vpack.c.bf16 %v1360_v55, %v1360_v55  ;;  %v1366_v62 = vpack.c.bf16 %v1358_v58, %v1358_v58  ;;  %v1355_v17 = vrot.slane %v1340_v16, 4  ;;  %v1363_v21 = vpack.c.bf16 %v1340_v16, %v1340_v16 }
 0x4ba   :  { %v1354_v4 = vsel %vm173_vm8, 0.0, %v1353_v63  ;;  %v3190_v51 = vunpack.i.l.bf16 %v3698_v24 }
 0x4bb   :  { %3198 = vxpose.binary.xlu1.c.b16.start.end [1/2] (short) (narrow) %v1368_v61, %v1367_v59, 16  ;;  %v1362_v7 = vpack.c.bf16 %v1354_v4, %v1354_v4  ;;  %v1356_v20 = vsel %vm173_vm8, 0.0, %v1355_v17  ;;  %v339_v61 = vrot.slane %v3191_v48, 4 }
 0x4bc   :  { %3192 = vxpose.binary.xlu0.c.b16.start.end [1/2] (short) (narrow) %v1366_v62, %v1365_v1, 16  ;;  %v1364_v22 = vpack.c.bf16 %v1356_v20, %v1356_v20  ;;  %v327_v1 = vrot.slane %v3190_v51, 4 }
 0x4bd   :  { %3195 = vxpose.binary.xlu2.c.b16.start.end [1/2] (short) (narrow) %v1362_v7, %v1361_v5, 16 }
 0x4cc   :  { %3206 = vxpose.binary.xlu0.c.b16.start.end [1/2] (short) (narrow) %v1364_v22, %v1363_v21, 16 }
 0x515   :  { %3202 = vrot.lane.b32.xlu1 %v3201_v6, %s3346_s24 }
 0x53d   :  { %920 = vmax.xlane.f32.xlu0 %v919_v15 }
 0x53f   :  { %923 = vmax.xlane.f32.xlu1 %v922_v60 }
 0x547   :  { %926 = vmax.xlane.f32.xlu1 %v925_v27 }
 0x55e   :  { %v3196_v25 = vpop.trf.xlu2 }
 0x566   :  { %v3197_v35 = vpop.trf.xlu2 }
 0x567   :  { %v3199_v30 = vpop.trf.xlu1 }
 0x568   :  { %v3193_v18 = vpop.trf.xlu0  ;;  %v1631_v32 = vrot.slane %v3199_v30, 4 }
 0x569   :  { %v1625_v28 = vrot.slane %v3193_v18, 4 }
 0x56b   :  { %v1626_v31 = vsel %vm173_vm8, %v1625_v28, %v3196_v25 }
 0x56c   :  { %v1630_v33 = vperm.slane %v1626_v31, %v3497_v2 }
 0x56e   :  { %v1639_v37 = vrot.slane %v1630_v33, 4 }
 0x56f   :  { %v3200_v39 = vpop.trf.xlu1 }
 0x570   :  { %v3194_v29 = vpop.trf.xlu0  ;;  %v1659_v42 = vrot.slane %v3200_v39, 4 }
 0x571   :  { %v1653_v34 = vrot.slane %v3194_v29, 4 }
 0x573   :  { %v1654_v54 = vsel %vm173_vm8, %v1653_v34, %v3197_v35 }
 0x574   :  { %v1658_v43 = vperm.slane %v1654_v54, %v3497_v2 }
 0x576   :  { %v1667_v52 = vrot.slane %v1658_v43, 4 }
 0x578   :  { %v3207_v26 = vpop.trf.xlu0 }
 0x579   :  { %v1632_v36 = vsel %vm173_vm8, %v1631_v32, %v3207_v26 }
 0x57a   :  { %v1636_v38 = vperm.slane %v1632_v36, %v3497_v2 }
 0x57c   :  { %v1637_v57 = vrot.slane %v1636_v38, 4  ;;  %v1640_v40 = vsel %vm173_vm8, %v1636_v38, %v1639_v37 }
 0x57d   :  { %v1648_v41 = vperm.slane %v1640_v40, %v3504_v9 }
 0x57e   :  { %v1638_v44 = vsel %vm173_vm8, %v1637_v57, %v1630_v33 }
 0x57f   :  { %v3710_v45 = vperm.slane %v1638_v44, %v3504_v9  ;;  %v1651_v47 = vrot.slane %v1648_v41, 4  ;;  %v1701_v5 = vshrl.u32 %v1648_v41, 16 }
 0x580   :  { %v3208_v46 = vpop.trf.xlu0 }
 0x581   :  { %v1660_v49 = vsel %vm173_vm8, %v1659_v42, %v3208_v46  ;;  %v1649_v50 = vrot.slane %v3710_v45, 4  ;;  %v1652_v59 = vsel %vm173_vm8, 0, %v1651_v47  ;;  %v1685_v7 = vshrl.u32 %v3710_v45, 16 }
 0x582   :  { %v1664_v53 = vperm.slane %v1660_v49, %v3497_v2  ;;  %v1709_v21 = vshrl.u32 %v1652_v59, 16 }
 0x583   :  { %v1650_v63 = vsel %vm173_vm8, 0, %v1649_v50 }
 0x584   :  { %v1665_v55 = vrot.slane %v1664_v53, 4  ;;  %v1668_v58 = vsel %vm173_vm8, %v1664_v53, %v1667_v52  ;;  %v1693_v60 = vshrl.u32 %v1650_v63, 16 }
 0x585   :  { %v1676_v62 = vperm.slane %v1668_v58, %v3504_v9 }
 0x586   :  { %v1666_v4 = vsel %vm173_vm8, %v1665_v55, %v1658_v43 }
 0x587   :  { %v3724_v12 = vperm.slane %v1666_v4, %v3504_v9  ;;  %v3203_v16 = vpop.permute.xlu1 %3202  ;;  %v1702_v17 = vshrl.u32 %v1676_v62, 16  ;;  %v1679_v20 = vrot.slane %v1676_v62, 4  ;;  %v1699_v15 = vpack.i.b16 %v1676_v62, %v1648_v41 }
 0x588   :  { %v3205_v22 = vunpack.i.h.bf16 %v3203_v16  ;;  %v3204_v6 = vunpack.i.l.bf16 %v3203_v16 }
 0x589   :  { %v1703_v27 = vpack.i.b16 %v1702_v17, %v1701_v5  ;;  %v1680_v24 = vsel %vm173_vm8, 0, %v1679_v20  ;;  %v1677_v18 = vrot.slane %v3724_v12, 4  ;;  %v1683_v25 = vpack.i.b16 %v3724_v12, %v3710_v45 }
 0x58a   :  { %v337_v28 = vrot.slane %v3205_v22, 4  ;;  %v340_v29 = vsel %vm173_vm8, %v3205_v22, %v339_v61  ;;  %v325_v30 = vrot.slane %v3204_v6, 4  ;;  %v328_v31 = vsel %vm173_vm8, %v3204_v6, %v327_v1 }
 0x58b   :  { %v348_v32 = vperm.slane %v340_v29, %v3497_v2  ;;  %v336_v33 = vperm.slane %v328_v31, %v3497_v2  ;;  %3215 = vxpose.binary.xlu0.c.b16.start.end [1/2] (short) (narrow) %v1703_v27, %v1699_v15, 16  ;;  %v1707_v34 = vpack.i.b16 %v1680_v24, %v1652_v59  ;;  %v1710_v35 = vshrl.u32 %v1680_v24, 16 }
 0x58c   :  { %v338_v26 = vsel %vm173_vm8, %v337_v28, %v3191_v48  ;;  %v326_v36 = vsel %vm173_vm8, %v325_v30, %v3190_v51  ;;  %v1678_v37 = vsel %vm173_vm8, 0, %v1677_v18  ;;  %v1686_v38 = vshrl.u32 %v3724_v12, 16 }
 0x58d   :  { %v344_v39 = vperm.slane %v338_v26, %v3497_v2  ;;  %v361_v54 = vrot.slane %v348_v32, 4  ;;  %v332_v57 = vperm.slane %v326_v36, %v3497_v2  ;;  %v363_v40 = vrot.slane %v336_v33, 4 }
 0x58e   :  { %v1711_v41 = vpack.i.b16 %v1710_v35, %v1709_v21  ;;  %v1691_v42 = vpack.i.b16 %v1678_v37, %v1650_v63  ;;  %v1694_v43 = vshrl.u32 %v1678_v37, 16  ;;  %v3740_v44 = vpack.i.b16 %v1686_v38, %v1685_v7 }
 0x58f   :  { %v349_v46 = vrot.slane %v344_v39, 4  ;;  %v351_v47 = vrot.slane %v332_v57, 4  ;;  %v362_v48 = vsel %vm173_vm8, %v361_v54, %v336_v33  ;;  %v364_v49 = vsel %vm173_vm8, %v348_v32, %v363_v40 }
 0x590   :  { %v368_v50 = vperm.slane %v362_v48, %v3504_v9  ;;  %v372_v51 = vperm.slane %v364_v49, %v3504_v9  ;;  %3209 = vxpose.binary.xlu2.c.b16.start.end [1/2] (short) (narrow) %v1711_v41, %v1707_v34, 16  ;;  %v1695_v52 = vpack.i.b16 %v1694_v43, %v1693_v60 }
 0x591   :  { %v350_v53 = vsel %vm173_vm8, %v349_v46, %v332_v57  ;;  %v352_v55 = vsel %vm173_vm8, %v344_v39, %v351_v47  ;;  %v3226_v12 = vpack.i.bf16 %v3648_v3, %v3646_v0 }
 0x592   :  { %v356_v58 = vperm.slane %v350_v53, %v3504_v9  ;;  %v360_v59 = vperm.slane %v352_v55, %v3504_v9  ;;  %v377_v61 = vrot.slane %v368_v50, 4  ;;  %v379_v62 = vrot.slane %v372_v51, 4  ;;  %3212 = vxpose.binary.xlu1.c.b16.start.end [1/2] (short) (narrow) %v1695_v52, %v1691_v42, 16 }
 0x593   :  { %v385_v63 = vpack.c.bf16 %v368_v50, %v368_v50  ;;  %v387_v1 = vpack.c.bf16 %v372_v51, %v372_v51 }
 0x594   :  { %v373_v4 = vrot.slane %v356_v58, 4  ;;  %v375_v5 = vrot.slane %v360_v59, 4  ;;  %v378_v7 = vsel %vm173_vm8, 0.0, %v377_v61  ;;  %v380_v16 = vsel %vm173_vm8, 0.0, %v379_v62 }
 0x595   :  { %v381_v17 = vpack.c.bf16 %v356_v58, %v356_v58  ;;  %v383_v20 = vpack.c.bf16 %v360_v59, %v360_v59  ;;  %v386_v21 = vpack.c.bf16 %v378_v7, %v378_v7  ;;  %v388_v22 = vpack.c.bf16 %v380_v16, %v380_v16 }
 0x596   :  { %v956_v6 = vrot.slane %v385_v63, 4  ;;  %v962_v15 = vrot.slane %v387_v1, 4  ;;  %v374_v60 = vsel %vm173_vm8, 0.0, %v373_v4  ;;  %v376_v27 = vsel %vm173_vm8, 0.0, %v375_v5 }
 0x597   :  { %v976_v24 = vrot.slane %v386_v21, 4  ;;  %v982_v18 = vrot.slane %v388_v22, 4  ;;  %v382_v28 = vpack.c.bf16 %v374_v60, %v374_v60  ;;  %v384_v29 = vpack.c.bf16 %v376_v27, %v376_v27 }
 0x598   :  { %v957_v30 = vsel %vm173_vm8, %v956_v6, %v381_v17  ;;  %v963_v31 = vsel %vm173_vm8, %v962_v15, %v383_v20  ;;  %v856_v27 = vadd.f32 %v3653_v23, %v3681_v13 }
 0x599   :  { %v967_v32 = vperm.slane %v963_v31, %v3497_v2  ;;  %v977_v33 = vsel %vm173_vm8, %v976_v24, %v382_v28  ;;  %v983_v34 = vsel %vm173_vm8, %v982_v18, %v384_v29  ;;  %v961_v26 = vperm.slane %v957_v30, %v3497_v2 }
 0x59a   :  { %v987_v35 = vperm.slane %v983_v34, %v3497_v2  ;;  %v981_v37 = vperm.slane %v977_v33, %v3497_v2  ;;  %v916_v24 = vsel %vm838_vm10, %v856_v27, -inf }
 0x59b   :  { %v968_v36 = vrot.slane %v967_v32, 4 }
 0x59c   :  { %v988_v38 = vrot.slane %v987_v35, 4 }
 0x59d   :  { %v969_v39 = vsel %vm173_vm8, %v968_v36, %v961_v26 }
 0x59e   :  { %v973_v54 = vperm.slane %v969_v39, %v3504_v9  ;;  %v989_v57 = vsel %vm173_vm8, %v988_v38, %v981_v37  ;;  %v1229_v37 = vrot.slane %v3646_v0, 4  ;;  %v1241_v39 = vrot.slane %v3648_v3, 4 }
 0x59f   :  { %v993_v40 = vperm.slane %v989_v57, %v3504_v9 }
 0x5a0   :  { %v974_v41 = vrot.slane %v973_v54, 4  ;;  %v999_v43 = vshrl.u32 %v973_v54, 16 }
 0x5a1   :  { %v998_v42 = vpack.i.b16 %v993_v40, %v973_v54  ;;  %v1000_v46 = vshrl.u32 %v993_v40, 16  ;;  %v994_v47 = vrot.slane %v993_v40, 4  ;;  %v1230_v40 = vsel %vm173_vm8, %v1229_v37, %v3481_v56 }
 0x5a2   :  { %v975_v48 = vsel %vm173_vm8, 0, %v974_v41 }
 0x5a3   :  { %v1012_v49 = vsel %vm842_vm9, %v998_v42, 0  ;;  %v1001_v50 = vpack.i.b16 %v1000_v46, %v999_v43  ;;  %v995_v51 = vsel %vm173_vm8, 0, %v994_v47  ;;  %v1005_v53 = vshrl.u32 %v975_v48, 16 }
 0x5a4   :  { %1021 = vmatpush.bf16.msrb.mxu2 %v1012_v49  ;;  %v1004_v52 = vpack.i.b16 %v995_v51, %v975_v48  ;;  %v1006_v55 = vshrl.u32 %v995_v51, 16  ;;  %v1242_v42 = vsel %vm173_vm8, %v1241_v39, %v3564_v19  ;;  %v1236_v43 = vperm.slane %v1230_v40, %v3497_v2 }
 0x5a5   :  { %v1031_v58 = vsel %vm842_vm9, %v1001_v50, 0 }
 0x5a6   :  { %1040 = vmatpush.bf16.msrb.mxu3 %v1031_v58  ;;  %v1050_v59 = vsel %vm842_vm9, %v1004_v52, 0  ;;  %v1007_v61 = vpack.i.b16 %v1006_v55, %v1005_v53  ;;  %v1255_v49 = vrot.slane %v1236_v43, 4 }
 0x5a7   :  { %1059 = vmatpush.bf16.msrb.mxu0 %v1050_v59 }
 0x5a8   :  { %v1069_v62 = vsel %vm842_vm9, %v1007_v61, 0 }
 0x5a9   :  { %1078 = vmatpush.bf16.msra.mxu1 %v1069_v62 }
 0x5b0   :  { %v921_v63 = vpop.xlane.xlu0 %920 }
 0x5b1   :  { %v929_v1 = vsub.f32 %v3684_v11, %v921_v63 }
 0x5b2   :  { %v924_v4 = vpop.xlane.xlu1 %923 }
 0x5b3   :  { %v934_v5 = vmul.f32 1.442695, %v929_v1  ;;  %v930_v7 = vsub.f32 %v3687_v14, %v924_v4 }
 0x5b5   :  { %3267 = vpow2.f32 %v934_v5  ;;  %v936_v16 = vmul.f32 1.442695, %v930_v7 }
 0x5b7   :  { %3269 = vpow2.f32 %v936_v16 }
 0x5ba   :  { %v927_v17 = vpop.xlane.xlu1 %926 }
 0x5bb   :  { %v3774_v20 = vpop.eup %3267  ;;  %v931_v21 = vsub.f32 %v3694_v8, %v927_v17  ;;  %v3221_v8 = vpack.i.bf16 %v3564_v19, %v3481_v56 }
 0x5bc   :  { %v953_v22 = vpack.c.bf16 %v3774_v20, %v3774_v20 }
 0x5bd   :  { %v3779_v6 = vpop.eup %3269  ;;  %v938_v15 = vmul.f32 1.442695, %v931_v21 }
 0x5be   :  { %2930 = vmatmul.msk.bf16.vlgmr.msrb.gmra.mxu3 %vm838_vm10, %v953_v22  ;;  %v954_v11 = vpack.c.bf16 %v3779_v6, %v3779_v6 }
 0x5bf   :  { %3271 = vpow2.f32 %v938_v15 }
 0x5c0   :  { %2931 = vmatmul.msk.bf16.vlgmr.msrb.gmra.mxu0 %vm838_vm10, %v954_v11 }
 0x5c5   :  { %v3785_v14 = vpop.eup %3271 }
 0x5c6   :  { %v955_v60 = vpack.c.bf16 %v3785_v14, %v3785_v14 }
 0x5c8   :  { %2932 = vmatmul.msk.bf16.vlgmr.msra.gmra.mxu1 %vm838_vm10, %v955_v60 }
 0x5f9   :  { %3222 = vrot.lane.b32.xlu0 %v3221_v8, %s3346_s24 }
 0x601   :  { %917 = vmax.xlane.f32.xlu2 %v916_v24 }
 0x62a   :  { %3218 = vxpose.binary.xlu2.c.b16.start.end [1/2] (short) (narrow) %v3740_v44, %v1683_v25, 16  ;;  %v1231_v25 = vrot.slane %v3481_v56, 4  ;;  %v1243_v44 = vrot.slane %v3564_v19, 4 }
 0x62c   :  { %v1232_v38 = vsel %vm173_vm8, %v3646_v0, %v1231_v25  ;;  %v1244_v54 = vsel %vm173_vm8, %v3648_v3, %v1243_v44  ;;  %v1248_v0 = vperm.slane %v1242_v42, %v3497_v2 }
 0x62d   :  { %v1240_v57 = vperm.slane %v1232_v38, %v3497_v2  ;;  %v1252_v41 = vperm.slane %v1244_v54, %v3497_v2 }
 0x62e   :  { %v1253_v50 = vrot.slane %v1248_v0, 4  ;;  %v1256_v51 = vsel %vm173_vm8, %v1248_v0, %v1255_v49 }
 0x62f   :  { %v1267_v46 = vrot.slane %v1240_v57, 4  ;;  %v1265_v47 = vrot.slane %v1252_v41, 4  ;;  %v1264_v52 = vperm.slane %v1256_v51, %v3504_v9 }
 0x630   :  { %v1254_v55 = vsel %vm173_vm8, %v1253_v50, %v1236_v43 }
 0x631   :  { %v3210_v33 = vpop.trf.xlu2  ;;  %v1268_v48 = vsel %vm173_vm8, %v1252_v41, %v1267_v46  ;;  %v1266_v56 = vsel %vm173_vm8, %v1265_v47, %v1240_v57  ;;  %v1260_v58 = vperm.slane %v1254_v55, %v3504_v9  ;;  %v1279_v59 = vrot.slane %v1264_v52, 4 }
 0x632   :  { %v1276_v3 = vperm.slane %v1268_v48, %v3504_v9  ;;  %v1272_v19 = vperm.slane %v1266_v56, %v3504_v9  ;;  %v1847_v15 = vrot.slane %v3210_v33, 4  ;;  %v1287_v60 = vpack.c.bf16 %v1264_v52, %v1264_v52 }
 0x633   :  { %v1277_v1 = vrot.slane %v1260_v58, 4  ;;  %v1280_v4 = vsel %vm173_vm8, 0.0, %v1279_v59 }
 0x634   :  { %v1283_v53 = vrot.slane %v1276_v3, 4  ;;  %v1281_v61 = vrot.slane %v1272_v19, 4  ;;  %v1291_v7 = vpack.c.bf16 %v1276_v3, %v1276_v3  ;;  %v1288_v17 = vpack.c.bf16 %v1280_v4, %v1280_v4 }
 0x635   :  { %v1278_v11 = vsel %vm173_vm8, 0.0, %v1277_v1  ;;  %v1289_v8 = vpack.c.bf16 %v1272_v19, %v1272_v19 }
 0x636   :  { %v1284_v62 = vsel %vm173_vm8, 0.0, %v1283_v53  ;;  %v1282_v5 = vsel %vm173_vm8, 0.0, %v1281_v61 }
 0x637   :  { %v1292_v63 = vpack.c.bf16 %v1284_v62, %v1284_v62  ;;  %v1290_v21 = vpack.c.bf16 %v1282_v5, %v1282_v5  ;;  %v3216_v24 = vpop.trf.xlu0 }
 0x639   :  { %v3806_v34 = vpop.trf.xlu2  ;;  %v1471_v22 = vrot.slane %v1292_v63, 4 }
 0x63a   :  { %v1867_v37 = vrot.slane %v3806_v34, 4 }
 0x63d   :  { %v3800_v18 = vpop.f32.mrf.mxu0 }
 0x63e   :  { %v3213_v16 = vpop.trf.xlu1 }
 0x63f   :  { %v3217_v34 = vpop.trf.xlu0 }
 0x640   :  { %v1861_v3 = vrot.slane %v3217_v34, 4 }
 0x641   :  { %v3802_v28 = vpop.f32.mrf.mxu3 }
 0x645   :  { %v1063_v29 = vpop.f32.mrf.mxu0  ;;  %v3804_v30 = vpop.f32.mrf.mxu1 }
 0x646   :  { %v1286_v29 = vpack.c.bf16 %v1278_v11, %v1278_v11  ;;  %v3214_v54 = vpop.trf.xlu1 }
 0x647   :  { %v1868_v47 = vsel %vm173_vm8, %v1867_v37, %v3214_v54 }
 0x648   :  { %v1872_v50 = vperm.slane %v1868_v47, %v3497_v2 }
 0x649   :  { %v1044_v31 = vpop.f32.mrf.mxu3 }
 0x64a   :  { %v1465_v31 = vrot.slane %v1290_v21, 4 }
 0x64c   :  { %v1466_v38 = vsel %vm173_vm8, %v1465_v31, %v1286_v29 }
 0x64d   :  { %v1082_v32 = vpop.f32.mrf.mxu1  ;;  %v1470_v43 = vperm.slane %v1466_v38, %v3497_v2 }
 0x64e   :  { %v1472_v32 = vsel %vm173_vm8, %v1471_v22, %v1288_v17 }
 0x64f   :  { %v1476_v33 = vperm.slane %v1472_v32, %v3497_v2 }
 0x651   :  { %v1477_v46 = vrot.slane %v1476_v33, 4 }
 0x653   :  { %v1478_v51 = vsel %vm173_vm8, %v1477_v46, %v1470_v43 }
 0x654   :  { %v1482_v55 = vperm.slane %v1478_v51, %v3504_v9 }
 0x656   :  { %v1483_v4 = vrot.slane %v1482_v55, 4 }
 0x66b   :  { %v3223_v54 = vpop.permute.xlu0 %3222 }
 0x674   :  { %v918_v23 = vpop.xlane.xlu2 %917 }
 0x675   :  { %v928_v35 = vsub.f32 %v856_v27, %v918_v23  ;;  %v1451_v27 = vrot.slane %v1291_v7, 4  ;;  %v1848_v23 = vsel %vm173_vm8, %v1847_v15, %v3213_v16  ;;  %v1489_v15 = vshrl.u32 %v1482_v55, 16 }
 0x676   :  { %v1852_v25 = vperm.slane %v1848_v23, %v3497_v2 }
 0x677   :  { %v932_v26 = vmul.f32 1.442695, %v928_v35  ;;  %v1285_v35 = vpack.c.bf16 %v1260_v58, %v1260_v58  ;;  %v1873_v58 = vrot.slane %v1872_v50, 4 }
 0x678   :  { %v1853_v41 = vrot.slane %v1852_v25, 4 }
 0x679   :  { %3273 = vpow2.f32 %v932_v26  ;;  %v1445_v26 = vrot.slane %v1289_v8, 4 }
 0x67b   :  { %v1446_v39 = vsel %vm173_vm8, %v1445_v26, %v1285_v35 }
 0x67c   :  { %v1450_v48 = vperm.slane %v1446_v39, %v3497_v2 }
 0x67f   :  { %v3808_v36 = vpop.eup %3273 }
 0x680   :  { %v952_v45 = vpack.c.bf16 %v3808_v36, %v3808_v36 }
 0x682   :  { %2929 = vmatmul.msk.bf16.vlgmr.msrb.gmra.mxu2 %vm838_vm10, %v952_v45  ;;  %v1452_v45 = vsel %vm173_vm8, %v1451_v27, %v1287_v60  ;;  %v1484_v27 = vsel %vm173_vm8, 0, %v1483_v4 }
 0x683   :  { %v1456_v44 = vperm.slane %v1452_v45, %v3497_v2  ;;  %v1495_v25 = vshrl.u32 %v1484_v27, 16 }
 0x685   :  { %v1457_v0 = vrot.slane %v1456_v44, 4 }
 0x687   :  { %v1458_v52 = vsel %vm173_vm8, %v1457_v0, %v1450_v48 }
 0x688   :  { %v1462_v61 = vperm.slane %v1458_v52, %v3504_v9 }
 0x68a   :  { %v1463_v7 = vrot.slane %v1462_v61, 4  ;;  %v1487_v23 = vpack.i.b16 %v1482_v55, %v1462_v61  ;;  %v1488_v35 = vshrl.u32 %v1462_v61, 16 }
 0x68c   :  { %v1464_v26 = vsel %vm173_vm8, 0, %v1463_v7  ;;  %v1490_v33 = vpack.i.b16 %v1489_v15, %v1488_v35 }
 0x68d   :  { %v1493_v37 = vpack.i.b16 %v1484_v27, %v1464_v26  ;;  %v1494_v38 = vshrl.u32 %v1464_v26, 16 }
 0x68f   :  { %v1496_v39 = vpack.i.b16 %v1495_v25, %v1494_v38 }
 0x693   :  { %3227 = vrot.lane.b32.xlu2 %v3226_v12, %s3346_s24  ;;  %v1841_v12 = vrot.slane %v3216_v24, 4  ;;  %s3350_s24 = smov [#allocation2]  }
 0x694   :  { %s2898_s25 = sshll.u32 %s3350_s24, 4  ;;  %s2899_s25 = int_to_ptr.vmem [resolvable:$true] %s2898_s25 }
 0x6cb   :  { %v3219_v57 = vpop.trf.xlu2 }
 0x6cc   :  { %v1842_v40 = vsel %vm173_vm8, %v1841_v12, %v3219_v57  ;;  %v3225_v57 = vunpack.i.h.bf16 %v3223_v54 }
 0x6cd   :  { %v1846_v42 = vperm.slane %v1842_v40, %v3497_v2  ;;  %v3224_v40 = vunpack.i.l.bf16 %v3223_v54 }
 0x6cf   :  { %v1854_v49 = vsel %vm173_vm8, %v1853_v41, %v1846_v42  ;;  %v1395_v42 = vrot.slane %v3225_v57, 4  ;;  %v1383_v43 = vrot.slane %v3224_v40, 4 }
 0x6d0   :  { %v1858_v56 = vperm.slane %v1854_v49, %v3504_v9 }
 0x6d2   :  { %v1859_v62 = vrot.slane %v1858_v56, 4  ;;  %v1884_v5 = vshrl.u32 %v1858_v56, 16 }
 0x6d3   :  { %v3220_v19 = vpop.trf.xlu2 }
 0x6d4   :  { %v1862_v53 = vsel %vm173_vm8, %v1861_v3, %v3220_v19  ;;  %v1860_v21 = vsel %vm173_vm8, 0, %v1859_v62 }
 0x6d5   :  { %v1866_v59 = vperm.slane %v1862_v53, %v3497_v2  ;;  %v1890_v29 = vshrl.u32 %v1860_v21, 16 }
 0x6d7   :  { %v1874_v63 = vsel %vm173_vm8, %v1873_v58, %v1866_v59 }
 0x6d8   :  { %v1878_v1 = vperm.slane %v1874_v63, %v3504_v9 }
 0x6da   :  { %v1883_v16 = vpack.i.b16 %v1878_v1, %v1858_v56  ;;  %v1885_v17 = vshrl.u32 %v1878_v1, 16  ;;  %v1879_v22 = vrot.slane %v1878_v1, 4 }
 0x6dc   :  { %v1897_v11 = vsel %vm842_vm9, %v1883_v16, 0  ;;  %v1886_v60 = vpack.i.b16 %v1885_v17, %v1884_v5  ;;  %v1880_v8 = vsel %vm173_vm8, 0, %v1879_v22 }
 0x6dd   :  { %1906 = vmatpush.bf16.msra.mxu2 %v1897_v11  ;;  %v1889_v24 = vpack.i.b16 %v1880_v8, %v1860_v21  ;;  %v1891_v31 = vshrl.u32 %v1880_v8, 16 }
 0x6de   :  { %v1916_v32 = vsel %vm842_vm9, %v1886_v60, 0 }
 0x6df   :  { %1925 = vmatpush.bf16.msra.mxu3 %v1916_v32  ;;  %v1935_v45 = vsel %vm842_vm9, %v1889_v24, 0  ;;  %v1892_v12 = vpack.i.b16 %v1891_v31, %v1890_v29 }
 0x6e0   :  { %2933 = vmatmul.msk.bf16.vlgmr.msra.gmra.mxu2 %vm838_vm10, %v1487_v23  ;;  %1944 = vmatpush.bf16.msra.mxu0 %v1935_v45 }
 0x6e1   :  { %v1954_v44 = vsel %vm842_vm9, %v1892_v12, 0 }
 0x6e2   :  { %2934 = vmatmul.msk.bf16.vlgmr.msra.gmra.mxu3 %vm838_vm10, %v1490_v33  ;;  %1963 = vmatpush.bf16.msrb.mxu1 %v1954_v44 }
 0x6e3   :  { %2935 = vmatmul.msk.bf16.vlgmr.msra.gmra.mxu0 %vm838_vm10, %v1493_v37 }
 0x6e5   :  { %2936 = vmatmul.msk.bf16.vlgmr.msrb.gmra.mxu1 %vm838_vm10, %v1496_v39 }
 0x6ed   :  { %v3228_v41 = vpop.permute.xlu2 %3227 }
 0x6ee   :  { %v3230_v46 = vunpack.i.h.bf16 %v3228_v41  ;;  %v3229_v0 = vunpack.i.l.bf16 %v3228_v41 }
 0x6f0   :  { %v1393_v47 = vrot.slane %v3230_v46, 4  ;;  %v1396_v48 = vsel %vm173_vm8, %v3230_v46, %v1395_v42  ;;  %v1381_v34 = vrot.slane %v3229_v0, 4  ;;  %v1384_v49 = vsel %vm173_vm8, %v3229_v0, %v1383_v43 }
 0x6f1   :  { %v1404_v3 = vperm.slane %v1396_v48, %v3497_v2  ;;  %v1392_v50 = vperm.slane %v1384_v49, %v3497_v2 }
 0x6f2   :  { %v1394_v51 = vsel %vm173_vm8, %v1393_v47, %v3225_v57  ;;  %v1382_v56 = vsel %vm173_vm8, %v1381_v34, %v3224_v40 }
 0x6f3   :  { %v1400_v52 = vperm.slane %v1394_v51, %v3497_v2  ;;  %v1417_v19 = vrot.slane %v1404_v3, 4  ;;  %v1388_v53 = vperm.slane %v1382_v56, %v3497_v2  ;;  %v1419_v55 = vrot.slane %v1392_v50, 4 }
 0x6f5   :  { %v1405_v58 = vrot.slane %v1400_v52, 4  ;;  %v1407_v59 = vrot.slane %v1388_v53, 4  ;;  %v1418_v61 = vsel %vm173_vm8, %v1417_v19, %v1392_v50  ;;  %v1420_v62 = vsel %vm173_vm8, %v1404_v3, %v1419_v55 }
 0x6f6   :  { %v1424_v63 = vperm.slane %v1418_v61, %v3504_v9  ;;  %v1428_v1 = vperm.slane %v1420_v62, %v3504_v9 }
 0x6f7   :  { %v1406_v4 = vsel %vm173_vm8, %v1405_v58, %v1388_v53  ;;  %v1408_v5 = vsel %vm173_vm8, %v1400_v52, %v1407_v59 }
 0x6f8   :  { %v1412_v7 = vperm.slane %v1406_v4, %v3504_v9  ;;  %v1416_v16 = vperm.slane %v1408_v5, %v3504_v9  ;;  %v1433_v17 = vrot.slane %v1424_v63, 4  ;;  %v1435_v21 = vrot.slane %v1428_v1, 4 }
 0x6f9   :  { %v1441_v22 = vpack.c.bf16 %v1424_v63, %v1424_v63  ;;  %v1443_v15 = vpack.c.bf16 %v1428_v1, %v1428_v1 }
 0x6fa   :  { %v1429_v11 = vrot.slane %v1412_v7, 4  ;;  %v1431_v60 = vrot.slane %v1416_v16, 4  ;;  %v1434_v8 = vsel %vm173_vm8, 0.0, %v1433_v17  ;;  %v1436_v27 = vsel %vm173_vm8, 0.0, %v1435_v21 }
 0x6fb   :  { %v1437_v24 = vpack.c.bf16 %v1412_v7, %v1412_v7  ;;  %v1439_v29 = vpack.c.bf16 %v1416_v16, %v1416_v16  ;;  %v1442_v31 = vpack.c.bf16 %v1434_v8, %v1434_v8  ;;  %v1444_v32 = vpack.c.bf16 %v1436_v27, %v1436_v27 }
 0x6fc   :  { %v1430_v23 = vsel %vm173_vm8, 0.0, %v1429_v11  ;;  %v1432_v35 = vsel %vm173_vm8, 0.0, %v1431_v60  ;;  %v2009_v26 = vrot.slane %v1441_v22, 4  ;;  %v2015_v45 = vrot.slane %v1443_v15, 4 }
 0x6fd   :  { %v1438_v12 = vpack.c.bf16 %v1430_v23, %v1430_v23  ;;  %v1440_v25 = vpack.c.bf16 %v1432_v35, %v1432_v35  ;;  %v2029_v33 = vrot.slane %v1442_v31, 4  ;;  %v2035_v44 = vrot.slane %v1444_v32, 4 }
 0x6fe   :  { %v2010_v37 = vsel %vm173_vm8, %v2009_v26, %v1437_v24  ;;  %v2016_v38 = vsel %vm173_vm8, %v2015_v45, %v1439_v29  ;;  %v943_v26 = vsel %vm838_vm10, %v3774_v20, 0.0 }
 0x6ff   :  { %v2020_v39 = vperm.slane %v2016_v38, %v3497_v2  ;;  %v2030_v54 = vsel %vm173_vm8, %v2029_v33, %v1438_v12  ;;  %v2036_v57 = vsel %vm173_vm8, %v2035_v44, %v1440_v25  ;;  %v2014_v41 = vperm.slane %v2010_v37, %v3497_v2 }
 0x700   :  { %v2040_v40 = vperm.slane %v2036_v57, %v3497_v2  ;;  %v2034_v43 = vperm.slane %v2030_v54, %v3497_v2  ;;  %v946_v12 = vsel %vm838_vm10, %v3779_v6, 0.0  ;;  %v940_v25 = vsel %vm838_vm10, %v3808_v36, 0.0 }
 0x701   :  { %v2021_v42 = vrot.slane %v2020_v39, 4 }
 0x702   :  { %v2041_v46 = vrot.slane %v2040_v40, 4 }
 0x703   :  { %v2022_v0 = vsel %vm173_vm8, %v2021_v42, %v2014_v41 }
 0x704   :  { %v2026_v47 = vperm.slane %v2022_v0, %v3504_v9  ;;  %v2042_v48 = vsel %vm173_vm8, %v2041_v46, %v2034_v43 }
 0x705   :  { %v3912_v34 = vpop.f32.mrf.mxu2  ;;  %v2046_v49 = vperm.slane %v2042_v48, %v3504_v9 }
 0x706   :  { %v2027_v3 = vrot.slane %v2026_v47, 4  ;;  %v2052_v51 = vshrl.u32 %v2026_v47, 16 }
 0x707   :  { %v2051_v50 = vpack.i.b16 %v2046_v49, %v2026_v47  ;;  %v2053_v56 = vshrl.u32 %v2046_v49, 16  ;;  %v2047_v52 = vrot.slane %v2046_v49, 4 }
 0x708   :  { %v2028_v19 = vsel %vm173_vm8, 0, %v2027_v3 }
 0x709   :  { %v2065_v53 = vsel %vm842_vm9, %v2051_v50, 0  ;;  %v2054_v55 = vpack.i.b16 %v2053_v56, %v2052_v51  ;;  %v2048_v58 = vsel %vm173_vm8, 0, %v2047_v52  ;;  %v2058_v61 = vshrl.u32 %v2028_v19, 16 }
 0x70a   :  { %2074 = vmatpush.bf16.msrb.mxu2 %v2065_v53  ;;  %v2057_v59 = vpack.i.b16 %v2048_v58, %v2028_v19  ;;  %v2059_v62 = vshrl.u32 %v2048_v58, 16 }
 0x70b   :  { %v2084_v63 = vsel %vm842_vm9, %v2054_v55, 0 }
 0x70c   :  { %2093 = vmatpush.bf16.msrb.mxu3 %v2084_v63  ;;  %v2103_v1 = vsel %vm842_vm9, %v2057_v59, 0  ;;  %v2060_v4 = vpack.i.b16 %v2059_v62, %v2058_v61 }
 0x70d   :  { %v1025_v5 = vpop.f32.mrf.mxu2  ;;  %2112 = vmatpush.bf16.msrb.mxu0 %v2103_v1 }
 0x70e   :  { %v2122_v7 = vsel %vm842_vm9, %v2060_v4, 0 }
 0x70f   :  { %2131 = vmatpush.bf16.msra.mxu1 %v2122_v7 }
 0x760   :  { %v1946_v16 = vpop.f32.mrf.mxu0 }
 0x761   :  { %v1947_v31 = vadd.f32 %v1946_v16, %v3681_v13 }
 0x762   :  { %v1965_v17 = vpop.f32.mrf.mxu1 }
 0x763   :  { %v1966_v21 = vadd.f32 %v1965_v17, %v3681_v13  ;;  %v1908_v22 = vpop.f32.mrf.mxu2  ;;  %v1975_v45 = vsel %vm838_vm10, %v1947_v31, -inf }
 0x764   :  { %v1909_v15 = vadd.f32 %v1908_v22, %v3681_v13 }
 0x765   :  { %v1927_v11 = vpop.f32.mrf.mxu3  ;;  %v1978_v60 = vsel %vm838_vm10, %v1966_v21, -inf }
 0x766   :  { %v1928_v8 = vadd.f32 %v1927_v11, %v3681_v13  ;;  %1979 = vmax.xlane.f32.xlu2 %v1978_v60  ;;  %v1969_v27 = vsel %vm838_vm10, %v1909_v15, -inf  ;;  %v949_v13 = vsel %vm838_vm10, %v3785_v14, 0.0 }
 0x767   :  { %1970 = vmax.xlane.f32.xlu1 %v1969_v27 }
 0x768   :  { %v1948_v24 = vpop.f32.mrf.mxu0  ;;  %v1972_v29 = vsel %vm838_vm10, %v1928_v8, -inf }
 0x769   :  { %1973 = vmax.xlane.f32.xlu0 %v1972_v29 }
 0x76a   :  { %v1967_v32 = vpop.f32.mrf.mxu1 }
 0x76b   :  { %v1910_v23 = vpop.f32.mrf.mxu2 }
 0x76d   :  { %v1929_v35 = vpop.f32.mrf.mxu3 }
 0x76e   :  { %944 = vadd.xlane.f32.xlu2 %v943_v26 }
 0x76f   :  { %1976 = vmax.xlane.f32.xlu1 %v1975_v45 }
 0x777   :  { %947 = vadd.xlane.f32.xlu1 %v946_v12 }
 0x77f   :  { %941 = vadd.xlane.f32.xlu1 %v940_v25 }
 0x787   :  { %950 = vadd.xlane.f32.xlu1 %v949_v13 }
 0x7d9   :  { %v1980_v33 = vpop.xlane.xlu2 %1979 }
 0x7da   :  { %v1984_v44 = vsub.f32 %v1966_v21, %v1980_v33  ;;  %v1971_v37 = vpop.xlane.xlu1 %1970 }
 0x7db   :  { %v1981_v20 = vsub.f32 %v1909_v15, %v1971_v37 }
 0x7dc   :  { %v1991_v38 = vmul.f32 1.442695, %v1984_v44  ;;  %v1974_v39 = vpop.xlane.xlu0 %1973 }
 0x7dd   :  { %v1985_v54 = vmul.f32 1.442695, %v1981_v20  ;;  %v1982_v57 = vsub.f32 %v1928_v8, %v1974_v39 }
 0x7de   :  { %3275 = vpow2.f32 %v1991_v38 }
 0x7df   :  { %3277 = vpow2.f32 %v1985_v54  ;;  %v1987_v6 = vmul.f32 1.442695, %v1982_v57 }
 0x7e1   :  { %3279 = vpow2.f32 %v1987_v6  ;;  %v945_v52 = vpop.xlane.xlu2 %944 }
 0x7e2   :  { %v1977_v40 = vpop.xlane.xlu1 %1976 }
 0x7e3   :  { %v1983_v41 = vsub.f32 %v1947_v31, %v1977_v40 }
 0x7e4   :  { %v3276_v36 = vpop.eup %3275 }
 0x7e5   :  { %v3278_v42 = vpop.eup %3277  ;;  %v2008_v43 = vpack.c.bf16 %v3276_v36, %v3276_v36  ;;  %v1989_v46 = vmul.f32 1.442695, %v1983_v41  ;;  %v2002_v14 = vsel %vm838_vm10, %v3276_v36, 0.0 }
 0x7e6   :  { %v2005_v0 = vpack.c.bf16 %v3278_v42, %v3278_v42  ;;  %2003 = vadd.xlane.f32.xlu0 %v2002_v14  ;;  %v1993_v47 = vsel %vm838_vm10, %v3278_v42, 0.0 }
 0x7e7   :  { %v3280_v48 = vpop.eup %3279  ;;  %3281 = vpow2.f32 %v1989_v46  ;;  %2940 = vmatmul.msk.bf16.vlgmr.msra.gmra.mxu1 %vm838_vm10, %v2008_v43  ;;  %1994 = vadd.xlane.f32.xlu1 %v1993_v47 }
 0x7e8   :  { %v2006_v49 = vpack.c.bf16 %v3280_v48, %v3280_v48  ;;  %2937 = vmatmul.msk.bf16.vlgmr.msrb.gmra.mxu2 %vm838_vm10, %v2005_v0  ;;  %v1996_v53 = vsel %vm838_vm10, %v3280_v48, 0.0 }
 0x7ea   :  { %2938 = vmatmul.msk.bf16.vlgmr.msrb.gmra.mxu3 %vm838_vm10, %v2006_v49  ;;  %v948_v3 = vpop.xlane.xlu1 %947 }
 0x7eb   :  { %3283 = vrcp.f32 %v948_v3 }
 0x7ed   :  { %v3282_v50 = vpop.eup %3281 }
 0x7ee   :  { %v2007_v51 = vpack.c.bf16 %v3282_v50, %v3282_v50  ;;  %v1999_v56 = vsel %vm838_vm10, %v3282_v50, 0.0 }
 0x7ef   :  { %2000 = vadd.xlane.f32.xlu1 %v1999_v56 }
 0x7f0   :  { %2939 = vmatmul.msk.bf16.vlgmr.msrb.gmra.mxu0 %vm838_vm10, %v2007_v51 }
 0x7f1   :  { %v3284_v55 = vpop.eup %3283 }
 0x7f2   :  { %v942_v19 = vpop.xlane.xlu1 %941  ;;  %v1090_v59 = vmul.f32 %v3284_v55, %v3800_v18 }
 0x7f3   :  { %3285 = vrcp.f32 %v942_v19 }
 0x7f4   :  { %3287 = vrcp.f32 %v945_v52  ;;  %v1092_v5 = vrot.slane %v1090_v59, 4 }
 0x7f7   :  { %1997 = vadd.xlane.f32.xlu1 %v1996_v53 }
 0x7f9   :  { %v3286_v58 = vpop.eup %3285 }
 0x7fa   :  { %v1088_v61 = vmul.f32 %v3286_v58, %v3912_v34  ;;  %v951_v62 = vpop.xlane.xlu1 %950  ;;  %v3288_v63 = vpop.eup %3287 }
 0x7fb   :  { %3289 = vrcp.f32 %v951_v62  ;;  %v1089_v4 = vmul.f32 %v3288_v63, %v3802_v28 }
 0x7fc   :  { %v1094_v1 = vrot.slane %v1088_v61, 4  ;;  %v1093_v16 = vsel %vm173_vm8, %v1092_v5, %v1088_v61 }
 0x7fd   :  { %v1106_v22 = vrot.slane %v1089_v4, 4  ;;  %v1099_v18 = vperm.slane %v1093_v16, %v3497_v2 }
 0x7fe   :  { %v1095_v7 = vsel %vm173_vm8, %v1090_v59, %v1094_v1 }
 0x7ff   :  { %v1103_v21 = vperm.slane %v1095_v7, %v3497_v2  ;;  %v1118_v27 = vrot.slane %v1099_v18, 4 }
 0x801   :  { %v3290_v17 = vpop.eup %3289  ;;  %v1130_v60 = vrot.slane %v1103_v21, 4 }
 0x802   :  { %v1091_v15 = vmul.f32 %v3290_v17, %v3804_v30 }
 0x804   :  { %v1104_v34 = vrot.slane %v1091_v15, 4  ;;  %v1107_v11 = vsel %vm173_vm8, %v1091_v15, %v1106_v22 }
 0x805   :  { %v1115_v8 = vperm.slane %v1107_v11, %v3497_v2 }
 0x806   :  { %v1105_v28 = vsel %vm173_vm8, %v1104_v34, %v1089_v4 }
 0x807   :  { %v1111_v24 = vperm.slane %v1105_v28, %v3497_v2  ;;  %v1128_v29 = vrot.slane %v1115_v8, 4  ;;  %v1131_v31 = vsel %vm173_vm8, %v1115_v8, %v1130_v60 }
 0x808   :  { %v1139_v32 = vperm.slane %v1131_v31, %v3504_v9 }
 0x809   :  { %v1116_v23 = vrot.slane %v1111_v24, 4  ;;  %v1119_v30 = vsel %vm173_vm8, %v1111_v24, %v1118_v27  ;;  %v1129_v35 = vsel %vm173_vm8, %v1128_v29, %v1103_v21 }
 0x80a   :  { %v1127_v26 = vperm.slane %v1119_v30, %v3504_v9  ;;  %v1135_v45 = vperm.slane %v1129_v35, %v3504_v9  ;;  %v1146_v12 = vrot.slane %v1139_v32, 4 }
 0x80b   :  { %v1117_v25 = vsel %vm173_vm8, %v1116_v23, %v1099_v18 }
 0x80c   :  { %v1123_v13 = vperm.slane %v1117_v25, %v3504_v9  ;;  %v1142_v33 = vrot.slane %v1127_v26, 4  ;;  %v1144_v44 = vrot.slane %v1135_v45, 4  ;;  %v1147_v37 = vsel %vm173_vm8, 0.0, %v1146_v12 }
 0x80d   :  { %v1164_v20 = vrot.slane %v1147_v37, 4  ;;  %v1159_v6 = vsel %vm173_vm8, %v1146_v12, %v1135_v45 }
 0x80e   :  { %v1140_v38 = vrot.slane %v1123_v13, 4  ;;  %v1143_v39 = vsel %vm173_vm8, 0.0, %v1142_v33  ;;  %v1145_v54 = vsel %vm173_vm8, 0.0, %v1144_v44  ;;  %v1148_v42 = vsel %vm173_vm8, %v1142_v33, %v1123_v13 }
 0x80f   :  { %v1153_v57 = vrot.slane %v1143_v39, 4  ;;  %v1165_v40 = vsel %vm173_vm8, %v1164_v20, %v1145_v54  ;;  %v1163_v14 = vperm.slane %v1159_v6, %v3497_v2  ;;  %v1152_v47 = vperm.slane %v1148_v42, %v3497_v2 }
 0x810   :  { %v1141_v41 = vsel %vm173_vm8, 0.0, %v1140_v38  ;;  %v1169_v36 = vperm.slane %v1165_v40, %v3497_v2 }
 0x811   :  { %v1154_v43 = vsel %vm173_vm8, %v1153_v57, %v1141_v41  ;;  %v1184_v26 = vrot.slane %v1163_v14, 4  ;;  %v1172_v12 = vrot.slane %v1152_v47, 4 }
 0x812   :  { %v1158_v46 = vperm.slane %v1154_v43, %v3497_v2  ;;  %v1182_v0 = vrot.slane %v1169_v36, 4 }
 0x813   :  { %v1185_v54 = vsel %vm173_vm8, %v1169_v36, %v1184_v26 }
 0x814   :  { %v1170_v48 = vrot.slane %v1158_v46, 4  ;;  %v1183_v49 = vsel %vm173_vm8, %v1182_v0, %v1163_v14  ;;  %v1173_v41 = vsel %vm173_vm8, %v1158_v46, %v1172_v12 }
 0x815   :  { %v3979_v3 = vperm.slane %v1183_v49, %v3504_v9  ;;  %v1181_v36 = vperm.slane %v1173_v41, %v3504_v9 }
 0x816   :  { %v1171_v50 = vsel %vm173_vm8, %v1170_v48, %v1152_v47 }
 0x817   :  { %v3983_v51 = vperm.slane %v1171_v50, %v3504_v9  ;;  %v1194_v56 = vrot.slane %v3979_v3, 4  ;;  %v1193_v50 = vperm.slane %v1185_v54, %v3504_v9 }
 0x819   :  { %v3988_v52 = vsel %vm173_vm8, %v1194_v56, %v3983_v51 }
 0x859   :  { %v2004_v55 = vpop.xlane.xlu0 %2003 }
 0x85a   :  { %v1995_v19 = vpop.xlane.xlu1 %1994 }
 0x85b   :  { %3291 = vrcp.f32 %v1995_v19 }
 0x85c   :  { %3293 = vrcp.f32 %v2004_v55 }
 0x861   :  { %v3292_v61 = vpop.eup %3291 }
 0x862   :  { %v2001_v53 = vpop.xlane.xlu1 %2000  ;;  %v3294_v63 = vpop.eup %3293 }
 0x863   :  { %3295 = vrcp.f32 %v2001_v53 }
 0x864   :  { %v2133_v58 = vpop.f32.mrf.mxu1 }
 0x865   :  { %v2144_v17 = vmul.f32 %v3294_v63, %v2133_v58 }
 0x867   :  { %v2157_v11 = vrot.slane %v2144_v17, 4 }
 0x869   :  { %v3296_v5 = vpop.eup %3295 }
 0x86a   :  { %v1998_v59 = vpop.xlane.xlu1 %1997 }
 0x86b   :  { %3297 = vrcp.f32 %v1998_v59  ;;  %v2076_v62 = vpop.f32.mrf.mxu2 }
 0x86c   :  { %v2141_v1 = vmul.f32 %v3292_v61, %v2076_v62  ;;  %v2135_v4 = vpop.f32.mrf.mxu1 }
 0x86d   :  { %v2095_v7 = vpop.f32.mrf.mxu3  ;;  %v2114_v16 = vpop.f32.mrf.mxu0 }
 0x86e   :  { %v2147_v21 = vrot.slane %v2141_v1, 4  ;;  %v2143_v22 = vmul.f32 %v3296_v5, %v2114_v16 }
 0x870   :  { %v2145_v15 = vrot.slane %v2143_v22, 4  ;;  %v2148_v18 = vsel %vm173_vm8, %v2143_v22, %v2147_v21  ;;  %v1198_v22 = vrot.slane %v1193_v50, 4 }
 0x871   :  { %v3298_v34 = vpop.eup %3297  ;;  %v2156_v27 = vperm.slane %v2148_v18, %v3497_v2 }
 0x872   :  { %v2142_v60 = vmul.f32 %v3298_v34, %v2095_v7  ;;  %v2146_v8 = vsel %vm173_vm8, %v2145_v15, %v2141_v1  ;;  %v1196_v15 = vrot.slane %v3983_v51, 4 }
 0x873   :  { %v2152_v28 = vperm.slane %v2146_v8, %v3497_v2  ;;  %v2078_v24 = vpop.f32.mrf.mxu2  ;;  %v2183_v44 = vrot.slane %v2156_v27, 4 }
 0x874   :  { %v2158_v29 = vsel %vm173_vm8, %v2157_v11, %v2142_v60  ;;  %v2159_v31 = vrot.slane %v2142_v60, 4 }
 0x875   :  { %v2164_v32 = vperm.slane %v2158_v29, %v3497_v2  ;;  %v2171_v23 = vrot.slane %v2152_v28, 4  ;;  %v2097_v30 = vpop.f32.mrf.mxu3  ;;  %v2116_v35 = vpop.f32.mrf.mxu0 }
 0x876   :  { %v2160_v45 = vsel %vm173_vm8, %v2144_v17, %v2159_v31  ;;  %v1200_v17 = vrot.slane %v1181_v36, 4  ;;  %v1197_v30 = vsel %vm173_vm8, %v3979_v3, %v1196_v15  ;;  %v3102_v3 = vld [vmem:[%s4233_s6 + $0x8] sm:$0xff] }
 0x877   :  { %v2168_v25 = vperm.slane %v2160_v45, %v3497_v2  ;;  %v2169_v13 = vrot.slane %v2164_v32, 4  ;;  %v2172_v33 = vsel %vm173_vm8, %v2164_v32, %v2171_v23  ;;  %v1199_v23 = vsel %vm173_vm8, %v1198_v22, %v1181_v36  ;;  %2300 = vmatpush.bf16.msra.mxu2 %v3102_v3  ;;  %v3104_v15 = vld [vmem:[%s4237_s10 + $0x8] sm:$0xff] }
 0x878   :  { %v2180_v37 = vperm.slane %v2172_v33, %v3504_v9  ;;  %v1201_v51 = vsel %vm173_vm8, %v1193_v50, %v1200_v17  ;;  %v3101_v33 = vld [vmem:[%s4233_s6] sm:$0xff]  ;;  %2396 = vmatpush.bf16.msra.mxu3 %v3104_v15 }
 0x879   :  { %v2181_v20 = vrot.slane %v2168_v25, 4  ;;  %v2170_v38 = vsel %vm173_vm8, %v2169_v13, %v2152_v28  ;;  %v2184_v39 = vsel %vm173_vm8, %v2168_v25, %v2183_v44 }
 0x87a   :  { %v2176_v57 = vperm.slane %v2170_v38, %v3504_v9  ;;  %v2192_v6 = vperm.slane %v2184_v39, %v3504_v9  ;;  %v2195_v40 = vrot.slane %v2180_v37, 4 }
 0x87b   :  { %v2182_v42 = vsel %vm173_vm8, %v2181_v20, %v2156_v27  ;;  %2301 = vmatpush.bf16.msra.mxu2 %v3101_v33 }
 0x87c   :  { %v2188_v43 = vperm.slane %v2182_v42, %v3504_v9  ;;  %v2193_v14 = vrot.slane %v2176_v57, 4  ;;  %v2196_v0 = vsel %vm173_vm8, 0.0, %v2195_v40  ;;  %v2199_v47 = vrot.slane %v2192_v6, 4 }
 0x87d   :  { %v2201_v48 = vsel %vm173_vm8, %v2195_v40, %v2176_v57  ;;  %v2206_v49 = vrot.slane %v2196_v0, 4 }
 0x87e   :  { %v2194_v56 = vsel %vm173_vm8, 0.0, %v2193_v14  ;;  %v2197_v19 = vrot.slane %v2188_v43, 4  ;;  %v2200_v46 = vsel %vm173_vm8, 0.0, %v2199_v47  ;;  %v2212_v53 = vsel %vm173_vm8, %v2199_v47, %v2188_v43 }
 0x87f   :  { %v2217_v55 = vrot.slane %v2200_v46, 4  ;;  %v2205_v58 = vperm.slane %v2201_v48, %v3497_v2  ;;  %v2207_v59 = vsel %vm173_vm8, %v2206_v49, %v2194_v56  ;;  %v2216_v61 = vperm.slane %v2212_v53, %v3497_v2  ;;  %v3249_v49 = vld [vmem:[%s4234_s7] ss:$0 sm:$0xff] }
 0x880   :  { %v2198_v62 = vsel %vm173_vm8, 0.0, %v2197_v19  ;;  %v2211_v63 = vperm.slane %v2207_v59, %v3497_v2  ;;  %v3311_v56 = vld [vmem:[%s4248_s26] sm:$0xff] }
 0x881   :  { %v2218_v1 = vsel %vm173_vm8, %v2217_v55, %v2198_v62  ;;  %v2225_v4 = vrot.slane %v2205_v58, 4  ;;  %v2237_v5 = vrot.slane %v2216_v61, 4  ;;  %v3312_v55 = vld [vmem:[%s4248_s26 + $0x8] sm:$0xff] }
 0x882   :  { %v2222_v7 = vperm.slane %v2218_v1, %v3497_v2  ;;  %v2223_v16 = vrot.slane %v2211_v63, 4 }
 0x883   :  { %v2226_v21 = vsel %vm173_vm8, %v2211_v63, %v2225_v4 }
 0x884   :  { %v2234_v18 = vperm.slane %v2226_v21, %v3504_v9  ;;  %v2238_v34 = vsel %vm173_vm8, %v2222_v7, %v2237_v5  ;;  %v2224_v11 = vsel %vm173_vm8, %v2223_v16, %v2205_v58  ;;  %v2235_v60 = vrot.slane %v2222_v7, 4 }
 0x885   :  { %v2246_v8 = vperm.slane %v2238_v34, %v3504_v9  ;;  %v2230_v28 = vperm.slane %v2224_v11, %v3504_v9  ;;  %v3112_v34 = vld [vmem:[%s4239_s12 + $0x18] sm:$0xff] }
 0x886   :  { %v2253_v27 = vrot.slane %v2234_v18, 4  ;;  %v2236_v2 = vsel %vm173_vm8, %v2235_v60, %v2216_v61  ;;  %2617 = vmatpush.bf16.msrb.mxu2 %v3112_v34  ;;  %v3254_v34 = vld [vmem:[%s4240_s13 + $0x1] ss:$0 sm:$0xff] }
 0x887   :  { %v2251_v24 = vrot.slane %v2246_v8, 4  ;;  %v2242_v29 = vperm.slane %v2236_v2, %v3504_v9  ;;  %v2249_v31 = vrot.slane %v2230_v28, 4 }
 0x888   :  { %v2254_v32 = vsel %vm173_vm8, %v2246_v8, %v2253_v27  ;;  %v3103_v8 = vld [vmem:[%s4237_s10] sm:$0xff]  ;;  %v3111_v27 = vld [vmem:[%s4239_s12 + $0x10] sm:$0xff] }
 0x889   :  { %v3241_v35 = vpack.i.bf16 %v2254_v32, %v1201_v51  ;;  %v2252_v26 = vsel %vm173_vm8, %v2251_v24, %v2234_v18  ;;  %v2247_v45 = vrot.slane %v2242_v29, 4  ;;  %v2250_v12 = vsel %vm173_vm8, %v2242_v29, %v2249_v31  ;;  %v3106_v18 = vld [vmem:[%s4239_s12 + $0x8] sm:$0xff]  ;;  %2397 = vmatpush.bf16.msra.mxu3 %v3103_v8  ;;  %v3124_v29 = vld [vmem:[%s4239_s12 + $0x38] sm:$0xff]  ;;  %v3117_v51 = vld [vmem:[%s4239_s12 + $0x20] sm:$0xff] }
 0x88a   :  { %v3236_v25 = vpack.i.bf16 %v2252_v26, %v1199_v23  ;;  %v3231_v13 = vpack.i.bf16 %v2250_v12, %v1197_v30  ;;  %2519 = vmatpush.bf16.msra.mxu0 %v3106_v18  ;;  %2618 = vmatpush.bf16.msrb.mxu2 %v3111_v27  ;;  %v3118_v24 = vld [vmem:[%s4239_s12 + $0x28] sm:$0xff]  ;;  %v3123_v32 = vld [vmem:[%s4239_s12 + $0x30] sm:$0xff] }
 0x88b   :  { %3242 = vrot.lane.b32.xlu1 %v3241_v35, %s3347_s29  ;;  %v2248_v9 = vsel %vm173_vm8, %v2247_v45, %v2230_v28  ;;  %v3105_v28 = vld [vmem:[%s4239_s12] sm:$0xff] }
 0x88c   :  { %3237 = vrot.lane.b32.xlu2 %v3236_v25, %s3348_s0  ;;  %3232 = vrot.lane.b32.xlu0 %v3231_v13, %s3349_s30 }
 0x88e   :  { %2520 = vmatpush.bf16.msra.mxu0 %v3105_v28 }
 0x892   :  { %2715 = vmatpush.bf16.msrb.mxu0 %v3118_v24 }
 0x896   :  { %2716 = vmatpush.bf16.msrb.mxu0 %v3117_v51 }
 0x8e6   :  { %v3238_v44 = vpop.permute.xlu2 %3237 }
 0x8e7   :  { %v3240_v54 = vunpack.i.h.bf16 %v3238_v44  ;;  %v3239_v57 = vunpack.i.l.bf16 %v3238_v44 }
 0x8fd   :  { %v3243_v37 = vpop.permute.xlu1 %3242 }
 0x8fe   :  { %v3233_v20 = vpop.permute.xlu0 %3232  ;;  %v3245_v6 = vunpack.i.h.bf16 %v3243_v37  ;;  %v3244_v40 = vunpack.i.l.bf16 %v3243_v37  ;;  %v3250_v37 = vld [vmem:[%s4235_s8] ss:$0 sm:$0xff] }
 0x8ff   :  { %v3235_v38 = vunpack.i.h.bf16 %v3233_v20  ;;  %v3234_v39 = vunpack.i.l.bf16 %v3233_v20 }
 0x901   :  { %v1214_v41 = vsel %vm838_vm10, %v3988_v52, %v3234_v39  ;;  %v2267_v42 = vsel %vm838_vm10, %v2248_v9, %v3235_v38 }
 0x902   :  { %v1216_v43 = vsel %vm1215_vm11, %v1214_v41, %v3239_v57  ;;  %v2268_v14 = vsel %vm1215_vm11, %v2267_v42, %v3240_v54  ;;  %v3251_v54 = vld [vmem:[%s4236_s9] ss:$0 sm:$0xff] }
 0x903   :  { %v1218_v0 = vsel %vm1217_vm12, %v1216_v43, %v3244_v40  ;;  %v2269_v47 = vsel %vm1217_vm12, %v2268_v14, %v3245_v6  ;;  %v3110_v14 = vld [vmem:[%s4241_s14 + $0x18] sm:$0xff] }
 0x904   :  { %v2270_v48 = vpack.c.bf16 %v2269_v47, %v1218_v0  ;;  %2572 = vmatpush.bf16.msrb.mxu1 %v3110_v14  ;;  %v3109_v0 = vld [vmem:[%s4241_s14 + $0x10] sm:$0xff]  ;;  %v3116_v47 = vld [vmem:[%s4241_s14 + $0x38] sm:$0xff] }
 0x905   :  { %2670 = vmatpush.bf16.msrb.mxu3 %v3116_v47 }
 0x906   :  { %2949 = vmatmul.msk.bf16.vlgmr.msra.gmra.mxu2 %vm61_vm0, %v2270_v48  ;;  %v3108_v48 = vld [vmem:[%s4241_s14 + $0x8] sm:$0xff] }
 0x907   :  { %2813 = vmatpush.bf16.msra.mxu2 %v3124_v29 }
 0x908   :  { %2573 = vmatpush.bf16.msrb.mxu1 %v3109_v0 }
 0x90b   :  { %2814 = vmatpush.bf16.msra.mxu2 %v3123_v32 }
 0x90c   :  { %2574 = vmatpush.bf16.msrb.mxu1 %v3108_v48 }
 0x989   :  { %v2303_v36 = vpop.f32.mrf.mxu2 }
 0x98a   :  { %v2304_v50 = vadd.f32 %v3249_v49, %v2303_v36  ;;  %v3107_v36 = vld [vmem:[%s4241_s14] sm:$0xff] }
 0x98b   :  { %2575 = vmatpush.bf16.msrb.mxu1 %v3107_v36 }
 0x98c   :  { %v4056_v52 = vadd.f32 %v3311_v56, %v2304_v50  ;;  %v3114_v50 = vld [vmem:[%s4241_s14 + $0x28] sm:$0xff]  ;;  %v3122_v56 = vld [vmem:[%s4241_s14 + $0x58] sm:$0xff] }
 0x98e   :  { %v2312_v19 = vsel %vm61_vm0, %v4056_v52, 0.0 }
 0x98f   :  { %2313 = vadd.xlane.f32.xlu0 %v2312_v19  ;;  %2768 = vmatpush.bf16.msra.mxu1 %v3122_v56  ;;  %v3113_v19 = vld [vmem:[%s4241_s14 + $0x20] sm:$0xff] }
 0x991   :  { %v2305_v46 = vpop.f32.mrf.mxu2 }
 0x992   :  { %v2306_v53 = vadd.f32 %v3249_v49, %v2305_v46  ;;  %v3115_v49 = vld [vmem:[%s4241_s14 + $0x30] sm:$0xff] }
 0x993   :  { %2671 = vmatpush.bf16.msrb.mxu3 %v3115_v49  ;;  %v3121_v46 = vld [vmem:[%s4241_s14 + $0x50] sm:$0xff] }
 0x994   :  { %v4063_v58 = vadd.f32 %v3312_v55, %v2306_v53  ;;  %2769 = vmatpush.bf16.msra.mxu1 %v3121_v46  ;;  %v3128_v53 = vld [vmem:[%s4241_s14 + $0x78] sm:$0xff]  ;;  %v3120_v55 = vld [vmem:[%s4241_s14 + $0x48] sm:$0xff] }
 0x996   :  { %v2315_v59 = vsel %vm61_vm0, %v4063_v58, 0.0 }
 0x997   :  { %2316 = vadd.xlane.f32.xlu2 %v2315_v59  ;;  %2672 = vmatpush.bf16.msrb.mxu3 %v3114_v50  ;;  %v3127_v59 = vld [vmem:[%s4241_s14 + $0x70] sm:$0xff] }
 0x998   :  { %2770 = vmatpush.bf16.msra.mxu1 %v3120_v55 }
 0x99b   :  { %2673 = vmatpush.bf16.msrb.mxu3 %v3113_v19 }
 0xa02   :  { %v2314_v61 = vpop.xlane.xlu0 %2313 }
 0xa03   :  { %v2318_v62 = vmul.f32 %v2314_v61, %v3450_v10  ;;  %v3119_v61 = vld [vmem:[%s4241_s14 + $0x40] sm:$0xff] }
 0xa04   :  { %2771 = vmatpush.bf16.msra.mxu1 %v3119_v61 }
 0xa05   :  { %v2320_v63 = vsub.f32 %v4056_v52, %v2318_v62  ;;  %v3126_v62 = vld [vmem:[%s4241_s14 + $0x68] sm:$0xff] }
 0xa07   :  { %v2322_v1 = vmul.f32 %v2320_v63, %v2320_v63 }
 0xa09   :  { %v2324_v4 = vsel %vm61_vm0, %v2322_v1, 0.0  ;;  %v3125_v1 = vld [vmem:[%s4241_s14 + $0x60] sm:$0xff] }
 0xa0a   :  { %v2317_v5 = vpop.xlane.xlu2 %2316  ;;  %2325 = vadd.xlane.f32.xlu1 %v2324_v4  ;;  %v3252_v4 = vld [vmem:[%s4240_s13] ss:$0 sm:$0xff] }
 0xa0b   :  { %v2319_v7 = vmul.f32 %v2317_v5, %v3450_v10  ;;  %v3253_v5 = vld [vmem:[%s4238_s11] ss:$0 sm:$0xff] }
 0xa0d   :  { %v2321_v16 = vsub.f32 %v4063_v58, %v2319_v7 }
 0xa0f   :  { %v2323_v17 = vmul.f32 %v2321_v16, %v2321_v16 }
 0xa11   :  { %v2327_v21 = vsel %vm61_vm0, %v2323_v17, 0.0 }
 0xa12   :  { %2328 = vadd.xlane.f32.xlu0 %v2327_v21 }
 0xa7d   :  { %v2326_v22 = vpop.xlane.xlu1 %2325 }
 0xa7e   :  { %v2330_v11 = vmul.f32 %v2326_v22, %v3450_v10 }
 0xa80   :  { %v2332_v60 = vadd.f32 1e-05, %v2330_v11 }
 0xa82   :  { %3299 = vrsqrt.f32 %v2332_v60  ;;  %vm2340_vm14 = vweird.f32 %v2332_v60 }
 0xa85   :  { %v2329_v2 = vpop.xlane.xlu0 %2328 }
 0xa86   :  { %v2331_v31 = vmul.f32 %v2329_v2, %v3450_v10 }
 0xa88   :  { %v3300_v23 = vpop.eup %3299  ;;  %v2333_v30 = vadd.f32 1e-05, %v2331_v31 }
 0xa89   :  { %v2335_v35 = vmul.f32 %v3300_v23, %v2332_v60  ;;  %vm2341_vm13 = vweird.f32 %v3300_v23 }
 0xa8a   :  { %3301 = vrsqrt.f32 %v2333_v30  ;;  %vm2342_vm15 = vmor %vm2340_vm14, %vm2341_vm13  ;;  %vm2350_vm2 = vweird.f32 %v2333_v30 }
 0xa8b   :  { %v2336_v26 = vmul.f32 %v3300_v23, %v2335_v35 }
 0xa8d   :  { %v2337_v45 = vmul.f32 0.5, %v2336_v26 }
 0xa8f   :  { %v2338_v12 = vsub.f32 1.5, %v2337_v45 }
 0xa90   :  { %v3302_v10 = vpop.eup %3301 }
 0xa91   :  { %v2339_v25 = vmul.f32 %v3300_v23, %v2338_v12  ;;  %v2345_v13 = vmul.f32 %v3302_v10, %v2333_v30  ;;  %vm2351_vm1 = vweird.f32 %v3302_v10  ;;  %v3255_v30 = vld [vmem:[%s4240_s13 + $0x2] ss:$0 sm:$0xff] }
 0xa92   :  { %vm2352_vm3 = vmor %vm2350_vm2, %vm2351_vm1 }
 0xa93   :  { %v2346_v9 = vmul.f32 %v3302_v10, %v2345_v13  ;;  %v2343_v3 = vsel %vm2342_vm15, %v3300_v23, %v2339_v25  ;;  %v3256_v25 = vld [vmem:[%s4240_s13 + $0x3] ss:$0 sm:$0xff] }
 0xa94   :  { %v2354_v20 = vmul.f32 %v2343_v3, %v2320_v63 }
 0xa95   :  { %v2347_v33 = vmul.f32 0.5, %v2346_v9 }
 0xa96   :  { %v2359_v57 = vmul.f32 %v3250_v37, %v2354_v20 }
 0xa97   :  { %v2348_v44 = vsub.f32 1.5, %v2347_v33 }
 0xa98   :  { %v2364_v41 = vadd.f32 %v3251_v54, %v2359_v57 }
 0xa99   :  { %v2349_v38 = vmul.f32 %v3302_v10, %v2348_v44 }
 0xa9b   :  { %v2353_v39 = vsel %vm2352_vm3, %v3302_v10, %v2349_v38 }
 0xa9c   :  { %v2355_v6 = vmul.f32 %v2353_v39, %v2321_v16 }
 0xa9e   :  { %v2360_v40 = vmul.f32 %v3250_v37, %v2355_v6 }
 0xaa0   :  { %v2365_v42 = vadd.f32 %v3251_v54, %v2360_v40 }
 0xaa2   :  { %v2366_v43 = vpack.c.bf16 %v2365_v42, %v2364_v41 }
 0xaa4   :  { %2958 = vmatmul.msk.bf16.vlgmr.msra.gmra.mxu3 %vm61_vm0, %v2366_v43  ;;  %2967 = vmatmul.msk.bf16.vlgmr.msra.gmra.mxu0 %vm61_vm0, %v2366_v43 }
 0xaa5   :  { %2997 = vmatmul.msk.bf16.vlgmr.msrb.gmra.mxu2 %vm61_vm0, %v2366_v43  ;;  %2866 = vmatpush.bf16.msra.mxu3 %v3128_v53 }
 0xaa9   :  { %2867 = vmatpush.bf16.msra.mxu3 %v3127_v59 }
 0xaad   :  { %2868 = vmatpush.bf16.msra.mxu3 %v3126_v62 }
 0xab1   :  { %2869 = vmatpush.bf16.msra.mxu3 %v3125_v1 }
 0xab4   :  { %3035 = vmatmul.msk.bf16.vlgmr.msrb.gmra.mxu0 %vm61_vm0, %v2366_v43 }
 0xab5   :  { %3073 = vmatmul.msk.bf16.vlgmr.msra.gmra.mxu2 %vm61_vm0, %v2366_v43 }
 0xb21   :  { %v2522_v63 = vpop.f32.mrf.mxu0 }
 0xb22   :  { %v2523_v16 = vadd.f32 %v3252_v4, %v2522_v63 }
 0xb24   :  { %v2527_v11 = vmax.f32 %v2523_v16, 0.0 }
 0xb27   :  { %v2399_v7 = vpop.f32.mrf.mxu3 }
 0xb28   :  { %v2400_v17 = vadd.f32 %v3253_v5, %v2399_v7  ;;  %v2620_v21 = vpop.f32.mrf.mxu2 }
 0xb29   :  { %v2524_v22 = vpop.f32.mrf.mxu0  ;;  %v2621_v28 = vadd.f32 %v3254_v34, %v2620_v21 }
 0xb2a   :  { %v2525_v15 = vadd.f32 %v3252_v4, %v2524_v22  ;;  %v2405_v18 = vsel %vm2404_vm4, %v2400_v17, -inf }
 0xb2b   :  { %2406 = vmax.xlane.f32.xlu2 %v2405_v18  ;;  %v2625_v32 = vmax.f32 %v2621_v28, 0.0 }
 0xb2c   :  { %v2528_v60 = vmax.f32 %v2525_v15, 0.0 }
 0xb2e   :  { %v2529_v8 = vpack.c.bf16 %v2528_v60, %v2527_v11 }
 0xb2f   :  { %v2401_v27 = vpop.f32.mrf.mxu3 }
 0xb30   :  { %v2402_v2 = vadd.f32 %v3253_v5, %v2401_v27  ;;  %v2622_v24 = vpop.f32.mrf.mxu2  ;;  %2984 = vmatmul.msk.bf16.vlgmr.msrb.gmra.mxu1 %vm2564_vm5, %v2529_v8  ;;  %v2459_v8 = vlaneseq }
 0xb31   :  { %v2623_v29 = vadd.f32 %v3254_v34, %v2622_v24  ;;  %v2718_v31 = vpop.f32.mrf.mxu0 }
 0xb32   :  { %v2408_v51 = vsel %vm2404_vm4, %v2402_v2, -inf  ;;  %v2719_v26 = vadd.f32 %v3255_v30, %v2718_v31  ;;  %v2460_v28 = vand.u32 127, %v2459_v8 }
 0xb33   :  { %v2626_v23 = vmax.f32 %v2623_v29, 0.0  ;;  %2409 = vmax.xlane.f32.xlu0 %v2408_v51 }
 0xb34   :  { %v2723_v13 = vmax.f32 %v2719_v26, 0.0 }
 0xb35   :  { %v2627_v35 = vpack.c.bf16 %v2626_v23, %v2625_v32 }
 0xb37   :  { %3022 = vmatmul.msk.bf16.vlgmr.msrb.gmra.mxu3 %vm2564_vm5, %v2627_v35 }
 0xb38   :  { %v2816_v45 = vpop.f32.mrf.mxu2 }
 0xb39   :  { %v2720_v12 = vpop.f32.mrf.mxu0  ;;  %v2817_v33 = vadd.f32 %v3256_v25, %v2816_v45 }
 0xb3a   :  { %v2721_v10 = vadd.f32 %v3255_v30, %v2720_v12 }
 0xb3b   :  { %v2821_v20 = vmax.f32 %v2817_v33, 0.0 }
 0xb3c   :  { %v2724_v9 = vmax.f32 %v2721_v10, 0.0 }
 0xb3e   :  { %v2725_v3 = vpack.c.bf16 %v2724_v9, %v2723_v13 }
 0xb40   :  { %v2818_v44 = vpop.f32.mrf.mxu2  ;;  %3060 = vmatmul.msk.bf16.vlgmr.msra.gmra.mxu1 %vm2564_vm5, %v2725_v3 }
 0xb41   :  { %v2819_v37 = vadd.f32 %v3256_v25, %v2818_v44 }
 0xb43   :  { %v2822_v38 = vmax.f32 %v2819_v37, 0.0 }
 0xb45   :  { %v2823_v39 = vpack.c.bf16 %v2822_v38, %v2821_v20 }
 0xb47   :  { %3098 = vmatmul.msk.bf16.vlgmr.msra.gmra.mxu3 %vm2564_vm5, %v2823_v39  ;;  %v3257_v39 = vld [vmem:[%s4242_s15] ss:$0 sm:$0xff] }
 0xb9e   :  { %v2407_v54 = vpop.xlane.xlu2 %2406 }
 0xb9f   :  { %v2411_v57 = vsub.f32 %v2400_v17, %v2407_v54  ;;  %v3258_v54 = vld [vmem:[%s4242_s15 + $0x1] ss:$0 sm:$0xff] }
 0xba1   :  { %v2413_v6 = vmul.f32 1.442695, %v2411_v57 }
 0xba3   :  { %3303 = vpow2.f32 %v2413_v6 }
 0xba6   :  { %v2410_v40 = vpop.xlane.xlu0 %2409 }
 0xba7   :  { %v2412_v41 = vsub.f32 %v2402_v2, %v2410_v40 }
 0xba9   :  { %v3304_v42 = vpop.eup %3303  ;;  %v2415_v43 = vmul.f32 1.442695, %v2412_v41 }
 0xbaa   :  { %v2417_v14 = vsel %vm2404_vm4, %v3304_v42, 0.0 }
 0xbab   :  { %3305 = vpow2.f32 %v2415_v43  ;;  %2418 = vadd.xlane.f32.xlu1 %v2417_v14 }
 0xbad   :  { %v2577_v33 = vpop.f32.mrf.mxu1 }
 0xbb1   :  { %v3306_v0 = vpop.eup %3305 }
 0xbb2   :  { %v2420_v47 = vsel %vm2404_vm4, %v3306_v0, 0.0 }
 0xbb3   :  { %2421 = vadd.xlane.f32.xlu2 %v2420_v47 }
 0xbb5   :  { %v2579_v37 = vpop.f32.mrf.mxu1 }
 0xbba   :  { %v2675_v44 = vpop.f32.mrf.mxu3 }
 0xbbb   :  { %v2676_v47 = vadd.f32 %v3258_v54, %v2675_v44 }
 0xbbd   :  { %v2773_v6 = vpop.f32.mrf.mxu1 }
 0xbc2   :  { %v2677_v20 = vpop.f32.mrf.mxu3 }
 0xbca   :  { %v2871_v43 = vpop.f32.mrf.mxu3 }
 0xc1e   :  { %v2419_v48 = vpop.xlane.xlu1 %2418 }
 0xc1f   :  { %3307 = vrcp.f32 %v2419_v48  ;;  %v2434_v19 = vand.u32 2147483648, %v2419_v48  ;;  %v2432_v53 = vand.u32 2147483647, %v2419_v48  ;;  %vm2428_vm7 = vweird.f32 %v2419_v48 }
 0xc21   :  { %v2435_v61 = vor.u32 1.1754944e-38, %v2434_v19  ;;  %vm2433_vm9 = vcmp.eq.f32.partialorder %v2432_v53, 8.507059e+37 }
 0xc25   :  { %v3308_v49 = vpop.eup %3307 }
 0xc26   :  { %v2424_v36 = vmul.f32 %v3308_v49, %v2419_v48  ;;  %v2422_v50 = vpop.xlane.xlu2 %2421  ;;  %vm2429_vm6 = vweird.f32 %v3308_v49  ;;  %v3260_v48 = vld [vmem:[%s4242_s15 + $0x3] ss:$0 sm:$0xff] }
 0xc27   :  { %3309 = vrcp.f32 %v2422_v50  ;;  %vm2430_vm8 = vmor %vm2428_vm7, %vm2429_vm6  ;;  %v2449_v7 = vand.u32 2147483648, %v2422_v50  ;;  %v2447_v17 = vand.u32 2147483647, %v2422_v50  ;;  %vm2443_vm11 = vweird.f32 %v2422_v50 }
 0xc28   :  { %v2425_v56 = vsub.f32 1.0, %v2424_v36 }
 0xc29   :  { %v2450_v15 = vor.u32 1.1754944e-38, %v2449_v7  ;;  %vm2448_vm13 = vcmp.eq.f32.partialorder %v2447_v17, 8.507059e+37  ;;  %v2580_v7 = vadd.f32 %v3257_v39, %v2579_v37  ;;  %v2873_v17 = vpop.f32.mrf.mxu3 }
 0xc2a   :  { %v2426_v46 = vmul.f32 %v3308_v49, %v2425_v56 }
 0xc2c   :  { %v2427_v55 = vadd.f32 %v3308_v49, %v2426_v46  ;;  %v2872_v46 = vadd.f32 %v3260_v48, %v2871_v43 }
 0xc2d   :  { %v3310_v59 = vpop.eup %3309 }
 0xc2e   :  { %v2439_v62 = vmul.f32 %v3310_v59, %v2422_v50  ;;  %v2431_v63 = vsel %vm2430_vm8, %v3308_v49, %v2427_v55  ;;  %vm2444_vm10 = vweird.f32 %v3310_v59 }
 0xc2f   :  { %v2436_v1 = vsel %vm2433_vm9, %v2435_v61, %v2431_v63  ;;  %vm2445_vm12 = vmor %vm2443_vm11, %vm2444_vm10 }
 0xc30   :  { %v2440_v4 = vsub.f32 1.0, %v2439_v62  ;;  %v2437_v5 = vmul.f32 %v3304_v42, %v2436_v1  ;;  %v3259_v42 = vld [vmem:[%s4242_s15 + $0x2] ss:$0 sm:$0xff]  ;;  %v2775_v1 = vpop.f32.mrf.mxu1 }
 0xc31   :  { %v2774_v36 = vadd.f32 %v3259_v42, %v2773_v6 }
 0xc32   :  { %v2441_v16 = vmul.f32 %v3310_v59, %v2440_v4  ;;  %v2453_v21 = vsel %vm2404_vm4, %v2437_v5, -inf  ;;  %2892 = vst.msk [vmem:[%s4244_s17] sm:$0xff] %vm2404_vm4, %v2437_v5 }
 0xc33   :  { %2454 = vmax.xlane.f32.xlu0 %v2453_v21 }
 0xc34   :  { %v2442_v22 = vadd.f32 %v3310_v59, %v2441_v16  ;;  %v2678_v16 = vadd.f32 %v3258_v54, %v2677_v20 }
 0xc36   :  { %v2446_v18 = vsel %vm2445_vm12, %v3310_v59, %v2442_v22  ;;  %v2776_v22 = vadd.f32 %v3259_v42, %v2775_v1 }
 0xc37   :  { %v2451_v34 = vsel %vm2448_vm13, %v2450_v15, %v2446_v18 }
 0xc38   :  { %v2452_v11 = vmul.f32 %v3306_v0, %v2451_v34  ;;  %v2578_v0 = vadd.f32 %v3257_v39, %v2577_v33 }
 0xc3a   :  { %v2456_v60 = vsel %vm2404_vm4, %v2452_v11, -inf  ;;  %2893 = vst.msk [vmem:[%s4244_s17 + $0x8] sm:$0xff] %vm2404_vm4, %v2452_v11 }
 0xc3b   :  { %2457 = vmax.xlane.f32.xlu1 %v2456_v60  ;;  %v2874_v60 = vadd.f32 %v3260_v48, %v2873_v17 }
 0xca6   :  { %v4197_v27 = vpop.xlane.xlu0 %2454 }
 0xca7   :  { %vm2461_vm14 = vcmp.eq.f32.partialorder %v2437_v5, %v4197_v27 }
 0xca8   :  { %v2463_v2 = vsel %vm2461_vm14, %v2460_v28, 4 }
 0xca9   :  { %v2465_v24 = vsel %vm2404_vm4, %v2463_v2, 2147483647 }
 0xcaa   :  { %v2467_v29 = vshra.s32 %v2465_v24, 16  ;;  %v2466_v26 = vand.u32 65535, %v2465_v24 }
 0xcac   :  { %v2469_v31 = vcvt.s32.f32 %v2467_v29  ;;  %v2468_v12 = vcvt.s32.f32 %v2466_v26 }
 0xcae   :  { %2470 = vmin.xlane.f32.xlu2 %v2469_v31  ;;  %v4201_v51 = vpop.xlane.xlu1 %2457 }
 0xcaf   :  { %vm2462_vm15 = vcmp.eq.f32.partialorder %v2452_v11, %v4201_v51 }
 0xcb0   :  { %v2464_v32 = vsel %vm2462_vm15, %v2460_v28, 4 }
 0xcb1   :  { %v2480_v23 = vsel %vm2404_vm4, %v2464_v32, 2147483647 }
 0xcb2   :  { %v2482_v30 = vshra.s32 %v2480_v23, 16  ;;  %v2481_v25 = vand.u32 65535, %v2480_v23 }
 0xcb4   :  { %v2484_v35 = vcvt.s32.f32 %v2482_v30  ;;  %v2483_v9 = vcvt.s32.f32 %v2481_v25 }
 0xcb6   :  { %2485 = vmin.xlane.f32.xlu0 %v2484_v35 }
 0xd21   :  { %v2471_v45 = vpop.xlane.xlu2 %2470 }
 0xd22   :  { %vm2472_vm1 = vcmp.eq.f32.partialorder %v2469_v31, %v2471_v45  ;;  %v2477_v38 = vcvt.f32.s32 %v2471_v45 }
 0xd23   :  { %v2473_v10 = vsel %vm2472_vm1, %v2468_v12, inf }
 0xd24   :  { %2474 = vmin.xlane.f32.xlu1 %v2473_v10  ;;  %v2478_v40 = vshll.u32 %v2477_v38, 16 }
 0xd29   :  { %v2486_v13 = vpop.xlane.xlu0 %2485 }
 0xd2a   :  { %vm2487_vm2 = vcmp.eq.f32.partialorder %v2484_v35, %v2486_v13  ;;  %v2492_v49 = vcvt.f32.s32 %v2486_v13 }
 0xd2b   :  { %v2488_v3 = vsel %vm2487_vm2, %v2483_v9, inf }
 0xd2c   :  { %2489 = vmin.xlane.f32.xlu2 %v2488_v3  ;;  %v2493_v59 = vshll.u32 %v2492_v49, 16 }
 0xd97   :  { %v2475_v57 = vpop.xlane.xlu1 %2474 }
 0xd98   :  { %v2476_v41 = vcvt.f32.s32 %v2475_v57 }
 0xd9a   :  { %v2479_v14 = vadd.s32 %v2478_v40, %v2476_v41 }
 0xd9c   :  { %vm2582_vm3 = vcmp.eq.s32.totalorder %v2479_v14, 0  ;;  %vm2680_vm4 = vcmp.eq.s32.totalorder %v2479_v14, 1  ;;  %vm2778_vm5 = vcmp.eq.s32.totalorder %v2479_v14, 2  ;;  %vm2876_vm6 = vcmp.eq.s32.totalorder %v2479_v14, 3 }
 0xd9d   :  { %v2588_v50 = vsel %vm2582_vm3, %v2578_v0, 0.0  ;;  %v2686_v56 = vsel %vm2680_vm4, %v2676_v47, 0.0  ;;  %v2784_v53 = vsel %vm2778_vm5, %v2774_v36, 0.0  ;;  %v2882_v63 = vsel %vm2876_vm6, %v2872_v46, 0.0 }
 0xd9e   :  { %v2688_v19 = vadd.f32 %v2686_v56, %v2588_v50 }
 0xd9f   :  { %v2490_v55 = vpop.xlane.xlu2 %2489 }
 0xda0   :  { %v2786_v61 = vadd.f32 %v2784_v53, %v2688_v19  ;;  %v2491_v62 = vcvt.f32.s32 %v2490_v55 }
 0xda2   :  { %v2884_v4 = vadd.f32 %v2882_v63, %v2786_v61  ;;  %v2494_v5 = vadd.s32 %v2493_v59, %v2491_v62 }
 0xda4   :  { %v2886_v21 = vmul.f32 %v2884_v4, %v4197_v27  ;;  %vm2583_vm7 = vcmp.eq.s32.totalorder %v2494_v5, 0  ;;  %vm2681_vm8 = vcmp.eq.s32.totalorder %v2494_v5, 1  ;;  %vm2779_vm9 = vcmp.eq.s32.totalorder %v2494_v5, 2 }
 0xda5   :  { %v2589_v15 = vsel %vm2583_vm7, %v2580_v7, 0.0  ;;  %v2687_v18 = vsel %vm2681_vm8, %v2678_v16, 0.0  ;;  %vm2877_vm10 = vcmp.eq.s32.totalorder %v2494_v5, 3  ;;  %v2785_v8 = vsel %vm2779_vm9, %v2776_v22, 0.0 }
 0xda6   :  { %v2689_v34 = vadd.f32 %v2687_v18, %v2589_v15  ;;  %v2888_v11 = vadd.f32 %v2886_v21, %v4056_v52  ;;  %v2883_v2 = vsel %vm2877_vm10, %v2874_v60, 0.0 }
 0xda8   :  { %v2787_v28 = vadd.f32 %v2785_v8, %v2689_v34  ;;  %2890 = vst.msk [vmem:[#allocation2] sm:$0xff] %vm61_vm0, %v2888_v11 }
 0xdaa   :  { %v2885_v24 = vadd.f32 %v2883_v2, %v2787_v28 }
 0xdac   :  { %v2887_v27 = vmul.f32 %v2885_v24, %v4201_v51 }
 0xdae   :  { %v2889_v29 = vadd.f32 %v2887_v27, %v4063_v58 }
 0xdb0   :  { %2891 = vst.msk [vmem:[#allocation2 + $0x8] sm:$0xff] %vm61_vm0, %v2889_v29 }
 0xdb1   :  { %2906 = dma.vmem_to_hbm [thread:$0]  %s2899_s25, 256, %s2901_s5, [#allocation3], %s3351_s27, %s3351_s27, %s3349_s30  }
 0xdb2   :  { %3337 = dma.done.wait [#allocation3], 256  }
 0xdb3   :  { %3338 = vsyncadd [#allocation3], 4294967040 }
 0xdb4   :  { %2915 = vsyncpa [#allocation3], 1 }

</bundles_post_ra>
